<compile_context>
chip_gen: v7x
topology: tpu7x:2x2x1
jax: 0.10.0
libtpu: 0.0.40
codegen_flags: <defaults>
</compile_context>

<pallas_src>
import jax
import jax.numpy as jnp
import numpy as np
from jax import lax
from jax.experimental import pallas as pl
from jax.experimental.pallas import tpu as pltpu

PAD_IDX = 0
EMBED_SIZE = 16
HIDDEN_SIZE = 32
NUM_LAYERS = 1            # single layer -> inter-layer dropout is a no-op
BIDIRECTIONAL = True
NUM_DIRS = 2 if BIDIRECTIONAL else 1
DROPOUT = 0.0             # TODO(synk): nn.LSTM dropout only applies between layers; inactive here
H_DIR = HIDDEN_SIZE // NUM_DIRS
LANE = 128


def _blstm_kernel(x_ref, vmask_ref, m_ref, wih_ref, bih_ref, whh_ref,
                  wout_ref, bout_ref, y_ref, pre_ref):
    # x_ref:     [T*B, 2*Din]  row t*B+b = [x[t,b] | x[T-1-t,b]]  (step-aligned)
    # vmask_ref: [T, B, 2H]    state-hold mask, fwd half = valid[t], bwd half = valid[T-1-t]
    # m_ref:     [T*B, 1]      output mask (1.0 on valid timesteps)
    # wih_ref:   [2*Din, 8H]   block-diag, gate-major interleaved (i_f|i_b|f_f|f_b|g_f|g_b|o_f|o_b)
    # bih_ref:   [1, 8H]       (b_ih + b_hh) for both directions, same column layout
    # whh_ref:   [2H, 8H]      block-diag recurrent weights, same column layout
    # wout_ref:  [2H, NTp]     [wout_f ; wout_b],  bout_ref: [1, NTp]
    # y_ref:     [T*B, NTp]    pre_ref: [T, B, 8H] scratch for the staged input projection
    T, B, G2 = pre_ref.shape
    Hd = G2 // 8                 # per-direction hidden size
    H2 = 2 * Hd                  # fused (fwd|bwd) block width

    # ---- hoisted input projection: ONE lane-dense matmul covers every timestep
    #      and both directions; biases folded in.  Rows are already step-aligned.
    pre = (jnp.dot(x_ref[...], wih_ref[...], preferred_element_type=jnp.float32)
           + bih_ref[...])                                        # [T*B, 8H]
    # stage into a leading-axis-indexable scratch once, BEFORE the recurrence
    # (per-step reads below are plain pre_ref[t]; no row slicing on the chain).
    for t in range(T):
        pre_ref[t] = pre[t * B:(t + 1) * B, :]

    whh = whh_ref[...]                                            # [2H, 8H]
    # static lane-id mask selecting the fused 'g' gate block (tanh lanes).
    lane = lax.broadcasted_iota(jnp.int32, (B, G2), 1)
    is_g = (lane >= 2 * H2) & (lane < 3 * H2)

    h_cat = jnp.zeros((B, H2), jnp.float32)                       # [h_fwd | h_bwd]
    c_cat = jnp.zeros((B, H2), jnp.float32)
    hist = []

    # ---- fused fwd+bwd recurrence, fully unrolled (T static, state is tiny):
    #      per step ONE [B,2H]@[2H,8H] dot, one sigmoid + two tanh EUP passes.
    for t in range(T):
        gates = pre_ref[t] + jnp.dot(h_cat, whh,
                                     preferred_element_type=jnp.float32)   # [B, 8H]
        act = jnp.where(is_g, jnp.tanh(gates), jax.nn.sigmoid(gates))
        i = act[:, 0:H2]
        f = act[:, H2:2 * H2]
        g = act[:, 2 * H2:3 * H2]
        o = act[:, 3 * H2:4 * H2]
        c_new = f * c_cat + i * g
        h_new = o * jnp.tanh(c_new)
        v = vmask_ref[t] > 0.0                                    # [B, 2H]
        # packed-sequence semantics: state only advances on valid timesteps
        h_cat = jnp.where(v, h_new, h_cat)
        c_cat = jnp.where(v, c_new, c_cat)
        hist.append(h_cat)

    # ---- realign the backward half to time order (register-resident, epilogue
    #      only) and run ONE fused output projection; lane/sublane-dense store.
    h_out = jnp.concatenate(
        [jnp.concatenate([hist[s][:, :Hd], hist[T - 1 - s][:, Hd:]], axis=1)
         for s in range(T)], axis=0)                              # [T*B, 2H]
    y = (jnp.dot(h_out, wout_ref[...], preferred_element_type=jnp.float32)
         + bout_ref[...])                                         # [T*B, NTp]
    y_ref[...] = y * m_ref[...]


def blstm_forward(x_ids, f, mask, params):
    """x_ids: [B,T] int32, f: [B,F,T] f32, mask: [B,T] (1/0 prefix mask)."""
    B, T = x_ids.shape
    emb = jnp.take(params["embed"], x_ids, axis=0)                 # [B,T,E]
    f1 = f[:, 0][:, :, None].astype(emb.dtype)                     # [B,T,1]
    xin = jnp.concatenate([emb, f1], axis=2)                       # [B,T,Din]
    Din = xin.shape[-1]
    Hd = H_DIR
    NT = params["wout_f"].shape[-1]
    NTp = ((NT + LANE - 1) // LANE) * LANE                         # lane-dense output

    x_tm = jnp.transpose(xin, (1, 0, 2)).astype(jnp.float32)       # [T,B,Din]
    # step-aligned bidirectional input: row (t*B+b) = [x[t,b] | x[T-1-t,b]]
    x_bi = jnp.concatenate([x_tm, x_tm[::-1]], axis=-1).reshape(T * B, 2 * Din)

    m_tm = jnp.transpose(mask.astype(jnp.float32), (1, 0))[:, :, None]   # [T,B,1]
    m_out = m_tm.reshape(T * B, 1)                                       # [T*B,1]
    # state-hold mask in the fused (fwd|bwd) layout, one row per step
    vmask = jnp.concatenate([jnp.broadcast_to(m_tm, (T, B, Hd)),
                             jnp.broadcast_to(m_tm[::-1], (T, B, Hd))], axis=-1)

    # --- weight packing (wrapper-side layout plumbing): gate-major interleave ---
    def interleave(a_f, a_b):
        # [R,4H],[R,4H] -> [R,8H] columns i_f|i_b|f_f|f_b|g_f|g_b|o_f|o_b
        R = a_f.shape[0]
        return jnp.stack([a_f.reshape(R, 4, Hd), a_b.reshape(R, 4, Hd)],
                         axis=2).reshape(R, 8 * Hd)

    z_ih = jnp.zeros_like(params["wih_f"])
    wih_bd = jnp.concatenate([interleave(params["wih_f"], z_ih),
                              interleave(z_ih, params["wih_b"])], axis=0)  # [2Din,8H]
    b_cat = interleave(params["b_f"], params["b_b"])                       # [1,8H]
    z_hh = jnp.zeros_like(params["whh_f"])
    whh_bd = jnp.concatenate([interleave(params["whh_f"], z_hh),
                              interleave(z_hh, params["whh_b"])], axis=0)  # [2H,8H]
    pad = ((0, 0), (0, NTp - NT))
    wout_cat = jnp.pad(jnp.concatenate([params["wout_f"], params["wout_b"]],
                                       axis=0), pad)                       # [2H,NTp]
    bout = jnp.pad(params["b_out"], pad)                                   # [1,NTp]

    # TODO(synk): for production batch sizes, tile B over a grid axis with
    # dimension_semantics=("parallel",) (2x on v7x's two TensorCores), keep the
    # weights as untiled resident operands, and re-derive the VMEM budget for
    # v7x's 64 MiB; at these demo shapes a single program is optimal.
    vmem = pl.BlockSpec(memory_space=pltpu.MemorySpace.VMEM)
    y_flat = pl.pallas_call(
        _blstm_kernel,
        out_shape=jax.ShapeDtypeStruct((T * B, NTp), jnp.float32),
        in_specs=[vmem] * 8,
        out_specs=vmem,
        scratch_shapes=[pltpu.VMEM((T, B, 8 * Hd), jnp.float32)],
    )(x_bi, vmask, m_out, wih_bd, b_cat, whh_bd, wout_cat, bout)

    return jnp.transpose(y_flat[:, :NT].reshape(T, B, NT), (1, 0, 2))  # [B,T,NT]


def reference_forward(x_ids, f, mask, params):
    """Pure-JAX reference (same math) for a correctness check."""
    emb = jnp.take(params["embed"], x_ids, axis=0)
    f1 = f[:, 0][:, :, None].astype(emb.dtype)
    xin = jnp.concatenate([emb, f1], axis=2)
    B, T, _ = xin.shape
    H = H_DIR
    x_tm = jnp.transpose(xin, (1, 0, 2))
    m_tm = jnp.transpose(mask.astype(jnp.float32), (1, 0))

    def cell(carry, inp, wih, whh, b):
        h, c = carry
        x_t, m_t = inp
        gates = x_t @ wih + h @ whh + b
        i = jax.nn.sigmoid(gates[:, :H])
        ff = jax.nn.sigmoid(gates[:, H:2 * H])
        g = jnp.tanh(gates[:, 2 * H:3 * H])
        o = jax.nn.sigmoid(gates[:, 3 * H:])
        c_new = ff * c + i * g
        h_new = o * jnp.tanh(c_new)
        m_t = m_t[:, None]
        h = m_t * h_new + (1 - m_t) * h
        c = m_t * c_new + (1 - m_t) * c
        return (h, c), h

    init = (jnp.zeros((B, H), jnp.float32), jnp.zeros((B, H), jnp.float32))
    _, hf = jax.lax.scan(lambda cr, inp: cell(cr, inp, params["wih_f"],
                                              params["whh_f"], params["b_f"]),
                         init, (x_tm, m_tm))
    _, hb = jax.lax.scan(lambda cr, inp: cell(cr, inp, params["wih_b"],
                                              params["whh_b"], params["b_b"]),
                         init, (x_tm[::-1], m_tm[::-1]))
    hb = hb[::-1]
    y = hf @ params["wout_f"] + hb @ params["wout_b"] + params["b_out"]
    y = y * m_tm[:, :, None]
    return jnp.transpose(y, (1, 0, 2))


def init_params(key, vocab_size, num_tags):
    Din = EMBED_SIZE + 1
    ks = jax.random.split(key, 11)
    k_lstm = 1.0 / np.sqrt(H_DIR)
    k_out = 1.0 / np.sqrt(HIDDEN_SIZE)

    def u(k, shape, bound):
        return jax.random.uniform(k, shape, jnp.float32, -bound, bound)

    embed = jax.random.normal(ks[0], (vocab_size, EMBED_SIZE), jnp.float32)
    embed = embed.at[PAD_IDX].set(0.0)                     # padding_idx row is zero
    # PyTorch gate order i,f,g,o; weights stored transposed for x @ W
    wih_f = u(ks[1], (Din, 4 * H_DIR), k_lstm)
    whh_f = u(ks[2], (H_DIR, 4 * H_DIR), k_lstm)
    b_f = u(ks[3], (1, 4 * H_DIR), k_lstm) + u(ks[4], (1, 4 * H_DIR), k_lstm)  # b_ih + b_hh
    wih_b = u(ks[5], (Din, 4 * H_DIR), k_lstm)
    whh_b = u(ks[6], (H_DIR, 4 * H_DIR), k_lstm)
    b_b = u(ks[7], (1, 4 * H_DIR), k_lstm) + u(ks[8], (1, 4 * H_DIR), k_lstm)
    wout = u(ks[9], (HIDDEN_SIZE, num_tags), k_out)        # Linear(hidden, num_tags)^T
    b_out = u(ks[10], (1, num_tags), k_out)
    return dict(embed=embed,
                wih_f=wih_f, whh_f=whh_f, b_f=b_f,
                wih_b=wih_b, whh_b=whh_b, b_b=b_b,
                wout_f=wout[:H_DIR], wout_b=wout[H_DIR:], b_out=b_out)


if __name__ == "__main__":
    key = jax.random.PRNGKey(0)
    B, T = 2, 8
    vocab_size, num_tags = 50, 5
    lengths = np.array([8, 6], dtype=np.int32)    # sorted descending (pack_padded_sequence)

    kx, kf, kp = jax.random.split(key, 3)
    t_idx = np.arange(T)[None, :]
    mask = jnp.asarray((t_idx < lengths[:, None]).astype(np.float32))   # [B,T]
    x_ids = jax.random.randint(kx, (B, T), 1, vocab_size)
    x_ids = jnp.where(mask > 0, x_ids, PAD_IDX).astype(jnp.int32)       # pad tokens = PAD_IDX
    f = jax.random.normal(kf, (B, 2, T), jnp.float32)                   # extra features, use f[:,0]

    params = init_params(kp, vocab_size, num_tags)

    y = blstm_forward(x_ids, f, mask, params)
    y = jax.block_until_ready(y)

    y_ref = reference_forward(x_ids, f, mask, params)
    np.testing.assert_allclose(np.asarray(y), np.asarray(y_ref), rtol=2e-3, atol=2e-3)
    assert y.shape == (B, T, num_tags)
    print("KERNEL_OK")
</pallas_src>

<mosaic_0001>
module attributes {stable_mosaic.version = 11 : i64} {
  func.func @_blstm_kernel(%arg0: memref<16x34xf32, #tpu.memory_space<vmem>>, %arg1: memref<8x2x32xf32, #tpu.memory_space<vmem>>, %arg2: memref<16x1xf32, #tpu.memory_space<vmem>>, %arg3: memref<34x128xf32, #tpu.memory_space<vmem>>, %arg4: memref<1x128xf32, #tpu.memory_space<vmem>>, %arg5: memref<32x128xf32, #tpu.memory_space<vmem>>, %arg6: memref<32x128xf32, #tpu.memory_space<vmem>>, %arg7: memref<1x128xf32, #tpu.memory_space<vmem>>, %arg8: memref<16x128xf32, #tpu.memory_space<vmem>>, %arg9: memref<8x2x128xf32, #tpu.memory_space<vmem>>) attributes {dimension_semantics = [], scalar_prefetch = 0 : i64, scratch_operands = 1 : i64, tpu.core_type = #tpu.core_type<tc>} {
    %c0 = arith.constant 0 : index
    %c0_0 = arith.constant 0 : index
    %0 = vector.load %arg0[%c0, %c0_0] : memref<16x34xf32, #tpu.memory_space<vmem>>, vector<16x34xf32>
    %c0_1 = arith.constant 0 : index
    %c0_2 = arith.constant 0 : index
    %1 = vector.load %arg3[%c0_1, %c0_2] : memref<34x128xf32, #tpu.memory_space<vmem>>, vector<34x128xf32>
    %cst = arith.constant dense<0.000000e+00> : vector<16x128xf32>
    %2 = tpu.matmul %0, %1, %cst {dimension_numbers = #tpu.dot_dimension_numbers<[1], [0], [0], [1], [0, 0, 1, 1], [], []>} : vector<16x34xf32>, vector<34x128xf32>, vector<16x128xf32> -> vector<16x128xf32>
    %c0_3 = arith.constant 0 : index
    %c0_4 = arith.constant 0 : index
    %3 = vector.load %arg4[%c0_3, %c0_4] : memref<1x128xf32, #tpu.memory_space<vmem>>, vector<1x128xf32>
    %4 = vector.broadcast %3 : vector<1x128xf32> to vector<16x128xf32>
    %5 = arith.addf %2, %4 : vector<16x128xf32>
    %6 = vector.extract_strided_slice %5 {offsets = [0, 0], sizes = [2, 128], strides = [1, 1]} : vector<16x128xf32> to vector<2x128xf32>
    %c0_5 = arith.constant 0 : index
    %c0_6 = arith.constant 0 : index
    %c0_7 = arith.constant 0 : index
    %7 = vector.load %arg9[%c0_5, %c0_6, %c0_7] : memref<8x2x128xf32, #tpu.memory_space<vmem>>, vector<1x2x128xf32>
    %8 = vector.shape_cast %7 : vector<1x2x128xf32> to vector<2x128xf32>
    %9 = vector.shape_cast %6 : vector<2x128xf32> to vector<1x2x128xf32>
    tpu.vector_store %arg9[%c0_5, %c0_6, %c0_7], %9 {strides = array<i32>} : memref<8x2x128xf32, #tpu.memory_space<vmem>>, vector<1x2x128xf32>,
    %10 = vector.extract_strided_slice %5 {offsets = [2, 0], sizes = [2, 128], strides = [1, 1]} : vector<16x128xf32> to vector<2x128xf32>
    %c1 = arith.constant 1 : index
    %c0_8 = arith.constant 0 : index
    %c0_9 = arith.constant 0 : index
    %11 = vector.load %arg9[%c1, %c0_8, %c0_9] : memref<8x2x128xf32, #tpu.memory_space<vmem>>, vector<1x2x128xf32>
    %12 = vector.shape_cast %11 : vector<1x2x128xf32> to vector<2x128xf32>
    %13 = vector.shape_cast %10 : vector<2x128xf32> to vector<1x2x128xf32>
    tpu.vector_store %arg9[%c1, %c0_8, %c0_9], %13 {strides = array<i32>} : memref<8x2x128xf32, #tpu.memory_space<vmem>>, vector<1x2x128xf32>,
    %14 = vector.extract_strided_slice %5 {offsets = [4, 0], sizes = [2, 128], strides = [1, 1]} : vector<16x128xf32> to vector<2x128xf32>
    %c2 = arith.constant 2 : index
    %c0_10 = arith.constant 0 : index
    %c0_11 = arith.constant 0 : index
    %15 = vector.load %arg9[%c2, %c0_10, %c0_11] : memref<8x2x128xf32, #tpu.memory_space<vmem>>, vector<1x2x128xf32>
    %16 = vector.shape_cast %15 : vector<1x2x128xf32> to vector<2x128xf32>
    %17 = vector.shape_cast %14 : vector<2x128xf32> to vector<1x2x128xf32>
    tpu.vector_store %arg9[%c2, %c0_10, %c0_11], %17 {strides = array<i32>} : memref<8x2x128xf32, #tpu.memory_space<vmem>>, vector<1x2x128xf32>,
    %18 = vector.extract_strided_slice %5 {offsets = [6, 0], sizes = [2, 128], strides = [1, 1]} : vector<16x128xf32> to vector<2x128xf32>
    %c3 = arith.constant 3 : index
    %c0_12 = arith.constant 0 : index
    %c0_13 = arith.constant 0 : index
    %19 = vector.load %arg9[%c3, %c0_12, %c0_13] : memref<8x2x128xf32, #tpu.memory_space<vmem>>, vector<1x2x128xf32>
    %20 = vector.shape_cast %19 : vector<1x2x128xf32> to vector<2x128xf32>
    %21 = vector.shape_cast %18 : vector<2x128xf32> to vector<1x2x128xf32>
    tpu.vector_store %arg9[%c3, %c0_12, %c0_13], %21 {strides = array<i32>} : memref<8x2x128xf32, #tpu.memory_space<vmem>>, vector<1x2x128xf32>,
    %22 = vector.extract_strided_slice %5 {offsets = [8, 0], sizes = [2, 128], strides = [1, 1]} : vector<16x128xf32> to vector<2x128xf32>
    %c4 = arith.constant 4 : index
    %c0_14 = arith.constant 0 : index
    %c0_15 = arith.constant 0 : index
    %23 = vector.load %arg9[%c4, %c0_14, %c0_15] : memref<8x2x128xf32, #tpu.memory_space<vmem>>, vector<1x2x128xf32>
    %24 = vector.shape_cast %23 : vector<1x2x128xf32> to vector<2x128xf32>
    %25 = vector.shape_cast %22 : vector<2x128xf32> to vector<1x2x128xf32>
    tpu.vector_store %arg9[%c4, %c0_14, %c0_15], %25 {strides = array<i32>} : memref<8x2x128xf32, #tpu.memory_space<vmem>>, vector<1x2x128xf32>,
    %26 = vector.extract_strided_slice %5 {offsets = [10, 0], sizes = [2, 128], strides = [1, 1]} : vector<16x128xf32> to vector<2x128xf32>
    %c5 = arith.constant 5 : index
    %c0_16 = arith.constant 0 : index
    %c0_17 = arith.constant 0 : index
    %27 = vector.load %arg9[%c5, %c0_16, %c0_17] : memref<8x2x128xf32, #tpu.memory_space<vmem>>, vector<1x2x128xf32>
    %28 = vector.shape_cast %27 : vector<1x2x128xf32> to vector<2x128xf32>
    %29 = vector.shape_cast %26 : vector<2x128xf32> to vector<1x2x128xf32>
    tpu.vector_store %arg9[%c5, %c0_16, %c0_17], %29 {strides = array<i32>} : memref<8x2x128xf32, #tpu.memory_space<vmem>>, vector<1x2x128xf32>,
    %30 = vector.extract_strided_slice %5 {offsets = [12, 0], sizes = [2, 128], strides = [1, 1]} : vector<16x128xf32> to vector<2x128xf32>
    %c6 = arith.constant 6 : index
    %c0_18 = arith.constant 0 : index
    %c0_19 = arith.constant 0 : index
    %31 = vector.load %arg9[%c6, %c0_18, %c0_19] : memref<8x2x128xf32, #tpu.memory_space<vmem>>, vector<1x2x128xf32>
    %32 = vector.shape_cast %31 : vector<1x2x128xf32> to vector<2x128xf32>
    %33 = vector.shape_cast %30 : vector<2x128xf32> to vector<1x2x128xf32>
    tpu.vector_store %arg9[%c6, %c0_18, %c0_19], %33 {strides = array<i32>} : memref<8x2x128xf32, #tpu.memory_space<vmem>>, vector<1x2x128xf32>,
    %34 = vector.extract_strided_slice %5 {offsets = [14, 0], sizes = [2, 128], strides = [1, 1]} : vector<16x128xf32> to vector<2x128xf32>
    %c7 = arith.constant 7 : index
    %c0_20 = arith.constant 0 : index
    %c0_21 = arith.constant 0 : index
    %35 = vector.load %arg9[%c7, %c0_20, %c0_21] : memref<8x2x128xf32, #tpu.memory_space<vmem>>, vector<1x2x128xf32>
    %36 = vector.shape_cast %35 : vector<1x2x128xf32> to vector<2x128xf32>
    %37 = vector.shape_cast %34 : vector<2x128xf32> to vector<1x2x128xf32>
    tpu.vector_store %arg9[%c7, %c0_20, %c0_21], %37 {strides = array<i32>} : memref<8x2x128xf32, #tpu.memory_space<vmem>>, vector<1x2x128xf32>,
    %c0_22 = arith.constant 0 : index
    %c0_23 = arith.constant 0 : index
    %38 = vector.load %arg5[%c0_22, %c0_23] : memref<32x128xf32, #tpu.memory_space<vmem>>, vector<32x128xf32>
    %39 = tpu.iota {dimensions = array<i32: 1>} : vector<2x128xi32>
    %c64_i32 = arith.constant 64 : i32
    %40 = vector.broadcast %c64_i32 : i32 to vector<2x128xi32>
    %41 = arith.cmpi sge, %39, %40 : vector<2x128xi32>
    %c96_i32 = arith.constant 96 : i32
    %42 = vector.broadcast %c96_i32 : i32 to vector<2x128xi32>
    %43 = arith.cmpi slt, %39, %42 : vector<2x128xi32>
    %44 = arith.andi %41, %43 : vector<2x128xi1>
    %cst_24 = arith.constant 0.000000e+00 : f32
    %45 = vector.broadcast %cst_24 : f32 to vector<2x32xf32>
    %cst_25 = arith.constant 0.000000e+00 : f32
    %46 = vector.broadcast %cst_25 : f32 to vector<2x32xf32>
    %c0_26 = arith.constant 0 : index
    %c0_27 = arith.constant 0 : index
    %c0_28 = arith.constant 0 : index
    %47 = vector.load %arg9[%c0_26, %c0_27, %c0_28] : memref<8x2x128xf32, #tpu.memory_space<vmem>>, vector<1x2x128xf32>
    %48 = vector.shape_cast %47 : vector<1x2x128xf32> to vector<2x128xf32>
    %cst_29 = arith.constant dense<0.000000e+00> : vector<2x128xf32>
    %49 = tpu.matmul %45, %38, %cst_29 {dimension_numbers = #tpu.dot_dimension_numbers<[1], [0], [0], [1], [0, 0, 1, 1], [], []>} : vector<2x32xf32>, vector<32x128xf32>, vector<2x128xf32> -> vector<2x128xf32>
    %50 = arith.addf %48, %49 : vector<2x128xf32>
    %51 = math.tanh %50 : vector<2x128xf32>
    %52 = arith.negf %50 : vector<2x128xf32>
    %53 = math.exp %52 : vector<2x128xf32>
    %cst_30 = arith.constant 1.000000e+00 : f32
    %54 = vector.broadcast %cst_30 : f32 to vector<2x128xf32>
    %55 = arith.addf %54, %53 : vector<2x128xf32>
    %56 = arith.divf %54, %55 : vector<2x128xf32>
    %57 = arith.select %44, %51, %56 : vector<2x128xi1>, vector<2x128xf32>
    %58 = vector.extract_strided_slice %57 {offsets = [0, 0], sizes = [2, 32], strides = [1, 1]} : vector<2x128xf32> to vector<2x32xf32>
    %59 = vector.extract_strided_slice %57 {offsets = [0, 32], sizes = [2, 32], strides = [1, 1]} : vector<2x128xf32> to vector<2x32xf32>
    %60 = vector.extract_strided_slice %57 {offsets = [0, 64], sizes = [2, 32], strides = [1, 1]} : vector<2x128xf32> to vector<2x32xf32>
    %61 = vector.extract_strided_slice %57 {offsets = [0, 96], sizes = [2, 32], strides = [1, 1]} : vector<2x128xf32> to vector<2x32xf32>
    %62 = arith.mulf %59, %46 : vector<2x32xf32>
    %63 = arith.mulf %58, %60 : vector<2x32xf32>
    %64 = arith.addf %62, %63 : vector<2x32xf32>
    %65 = math.tanh %64 : vector<2x32xf32>
    %66 = arith.mulf %61, %65 : vector<2x32xf32>
    %c0_31 = arith.constant 0 : index
    %c0_32 = arith.constant 0 : index
    %c0_33 = arith.constant 0 : index
    %67 = vector.load %arg1[%c0_31, %c0_32, %c0_33] : memref<8x2x32xf32, #tpu.memory_space<vmem>>, vector<1x2x32xf32>
    %68 = vector.shape_cast %67 : vector<1x2x32xf32> to vector<2x32xf32>
    %cst_34 = arith.constant 0.000000e+00 : f32
    %69 = vector.broadcast %cst_34 : f32 to vector<2x32xf32>
    %70 = arith.cmpf ogt, %68, %69 : vector<2x32xf32>
    %71 = arith.select %70, %66, %45 : vector<2x32xi1>, vector<2x32xf32>
    %72 = arith.select %70, %64, %46 : vector<2x32xi1>, vector<2x32xf32>
    %c1_35 = arith.constant 1 : index
    %c0_36 = arith.constant 0 : index
    %c0_37 = arith.constant 0 : index
    %73 = vector.load %arg9[%c1_35, %c0_36, %c0_37] : memref<8x2x128xf32, #tpu.memory_space<vmem>>, vector<1x2x128xf32>
    %74 = vector.shape_cast %73 : vector<1x2x128xf32> to vector<2x128xf32>
    %cst_38 = arith.constant dense<0.000000e+00> : vector<2x128xf32>
    %75 = tpu.matmul %71, %38, %cst_38 {dimension_numbers = #tpu.dot_dimension_numbers<[1], [0], [0], [1], [0, 0, 1, 1], [], []>} : vector<2x32xf32>, vector<32x128xf32>, vector<2x128xf32> -> vector<2x128xf32>
    %76 = arith.addf %74, %75 : vector<2x128xf32>
    %77 = math.tanh %76 : vector<2x128xf32>
    %78 = arith.negf %76 : vector<2x128xf32>
    %79 = math.exp %78 : vector<2x128xf32>
    %cst_39 = arith.constant 1.000000e+00 : f32
    %80 = vector.broadcast %cst_39 : f32 to vector<2x128xf32>
    %81 = arith.addf %80, %79 : vector<2x128xf32>
    %82 = arith.divf %80, %81 : vector<2x128xf32>
    %83 = arith.select %44, %77, %82 : vector<2x128xi1>, vector<2x128xf32>
    %84 = vector.extract_strided_slice %83 {offsets = [0, 0], sizes = [2, 32], strides = [1, 1]} : vector<2x128xf32> to vector<2x32xf32>
    %85 = vector.extract_strided_slice %83 {offsets = [0, 32], sizes = [2, 32], strides = [1, 1]} : vector<2x128xf32> to vector<2x32xf32>
    %86 = vector.extract_strided_slice %83 {offsets = [0, 64], sizes = [2, 32], strides = [1, 1]} : vector<2x128xf32> to vector<2x32xf32>
    %87 = vector.extract_strided_slice %83 {offsets = [0, 96], sizes = [2, 32], strides = [1, 1]} : vector<2x128xf32> to vector<2x32xf32>
    %88 = arith.mulf %85, %72 : vector<2x32xf32>
    %89 = arith.mulf %84, %86 : vector<2x32xf32>
    %90 = arith.addf %88, %89 : vector<2x32xf32>
    %91 = math.tanh %90 : vector<2x32xf32>
    %92 = arith.mulf %87, %91 : vector<2x32xf32>
    %c1_40 = arith.constant 1 : index
    %c0_41 = arith.constant 0 : index
    %c0_42 = arith.constant 0 : index
    %93 = vector.load %arg1[%c1_40, %c0_41, %c0_42] : memref<8x2x32xf32, #tpu.memory_space<vmem>>, vector<1x2x32xf32>
    %94 = vector.shape_cast %93 : vector<1x2x32xf32> to vector<2x32xf32>
    %cst_43 = arith.constant 0.000000e+00 : f32
    %95 = vector.broadcast %cst_43 : f32 to vector<2x32xf32>
    %96 = arith.cmpf ogt, %94, %95 : vector<2x32xf32>
    %97 = arith.select %96, %92, %71 : vector<2x32xi1>, vector<2x32xf32>
    %98 = arith.select %96, %90, %72 : vector<2x32xi1>, vector<2x32xf32>
    %c2_44 = arith.constant 2 : index
    %c0_45 = arith.constant 0 : index
    %c0_46 = arith.constant 0 : index
    %99 = vector.load %arg9[%c2_44, %c0_45, %c0_46] : memref<8x2x128xf32, #tpu.memory_space<vmem>>, vector<1x2x128xf32>
    %100 = vector.shape_cast %99 : vector<1x2x128xf32> to vector<2x128xf32>
    %cst_47 = arith.constant dense<0.000000e+00> : vector<2x128xf32>
    %101 = tpu.matmul %97, %38, %cst_47 {dimension_numbers = #tpu.dot_dimension_numbers<[1], [0], [0], [1], [0, 0, 1, 1], [], []>} : vector<2x32xf32>, vector<32x128xf32>, vector<2x128xf32> -> vector<2x128xf32>
    %102 = arith.addf %100, %101 : vector<2x128xf32>
    %103 = math.tanh %102 : vector<2x128xf32>
    %104 = arith.negf %102 : vector<2x128xf32>
    %105 = math.exp %104 : vector<2x128xf32>
    %cst_48 = arith.constant 1.000000e+00 : f32
    %106 = vector.broadcast %cst_48 : f32 to vector<2x128xf32>
    %107 = arith.addf %106, %105 : vector<2x128xf32>
    %108 = arith.divf %106, %107 : vector<2x128xf32>
    %109 = arith.select %44, %103, %108 : vector<2x128xi1>, vector<2x128xf32>
    %110 = vector.extract_strided_slice %109 {offsets = [0, 0], sizes = [2, 32], strides = [1, 1]} : vector<2x128xf32> to vector<2x32xf32>
    %111 = vector.extract_strided_slice %109 {offsets = [0, 32], sizes = [2, 32], strides = [1, 1]} : vector<2x128xf32> to vector<2x32xf32>
    %112 = vector.extract_strided_slice %109 {offsets = [0, 64], sizes = [2, 32], strides = [1, 1]} : vector<2x128xf32> to vector<2x32xf32>
    %113 = vector.extract_strided_slice %109 {offsets = [0, 96], sizes = [2, 32], strides = [1, 1]} : vector<2x128xf32> to vector<2x32xf32>
    %114 = arith.mulf %111, %98 : vector<2x32xf32>
    %115 = arith.mulf %110, %112 : vector<2x32xf32>
    %116 = arith.addf %114, %115 : vector<2x32xf32>
    %117 = math.tanh %116 : vector<2x32xf32>
    %118 = arith.mulf %113, %117 : vector<2x32xf32>
    %c2_49 = arith.constant 2 : index
    %c0_50 = arith.constant 0 : index
    %c0_51 = arith.constant 0 : index
    %119 = vector.load %arg1[%c2_49, %c0_50, %c0_51] : memref<8x2x32xf32, #tpu.memory_space<vmem>>, vector<1x2x32xf32>
    %120 = vector.shape_cast %119 : vector<1x2x32xf32> to vector<2x32xf32>
    %cst_52 = arith.constant 0.000000e+00 : f32
    %121 = vector.broadcast %cst_52 : f32 to vector<2x32xf32>
    %122 = arith.cmpf ogt, %120, %121 : vector<2x32xf32>
    %123 = arith.select %122, %118, %97 : vector<2x32xi1>, vector<2x32xf32>
    %124 = arith.select %122, %116, %98 : vector<2x32xi1>, vector<2x32xf32>
    %c3_53 = arith.constant 3 : index
    %c0_54 = arith.constant 0 : index
    %c0_55 = arith.constant 0 : index
    %125 = vector.load %arg9[%c3_53, %c0_54, %c0_55] : memref<8x2x128xf32, #tpu.memory_space<vmem>>, vector<1x2x128xf32>
    %126 = vector.shape_cast %125 : vector<1x2x128xf32> to vector<2x128xf32>
    %cst_56 = arith.constant dense<0.000000e+00> : vector<2x128xf32>
    %127 = tpu.matmul %123, %38, %cst_56 {dimension_numbers = #tpu.dot_dimension_numbers<[1], [0], [0], [1], [0, 0, 1, 1], [], []>} : vector<2x32xf32>, vector<32x128xf32>, vector<2x128xf32> -> vector<2x128xf32>
    %128 = arith.addf %126, %127 : vector<2x128xf32>
    %129 = math.tanh %128 : vector<2x128xf32>
    %130 = arith.negf %128 : vector<2x128xf32>
    %131 = math.exp %130 : vector<2x128xf32>
    %cst_57 = arith.constant 1.000000e+00 : f32
    %132 = vector.broadcast %cst_57 : f32 to vector<2x128xf32>
    %133 = arith.addf %132, %131 : vector<2x128xf32>
    %134 = arith.divf %132, %133 : vector<2x128xf32>
    %135 = arith.select %44, %129, %134 : vector<2x128xi1>, vector<2x128xf32>
    %136 = vector.extract_strided_slice %135 {offsets = [0, 0], sizes = [2, 32], strides = [1, 1]} : vector<2x128xf32> to vector<2x32xf32>
    %137 = vector.extract_strided_slice %135 {offsets = [0, 32], sizes = [2, 32], strides = [1, 1]} : vector<2x128xf32> to vector<2x32xf32>
    %138 = vector.extract_strided_slice %135 {offsets = [0, 64], sizes = [2, 32], strides = [1, 1]} : vector<2x128xf32> to vector<2x32xf32>
    %139 = vector.extract_strided_slice %135 {offsets = [0, 96], sizes = [2, 32], strides = [1, 1]} : vector<2x128xf32> to vector<2x32xf32>
    %140 = arith.mulf %137, %124 : vector<2x32xf32>
    %141 = arith.mulf %136, %138 : vector<2x32xf32>
    %142 = arith.addf %140, %141 : vector<2x32xf32>
    %143 = math.tanh %142 : vector<2x32xf32>
    %144 = arith.mulf %139, %143 : vector<2x32xf32>
    %c3_58 = arith.constant 3 : index
    %c0_59 = arith.constant 0 : index
    %c0_60 = arith.constant 0 : index
    %145 = vector.load %arg1[%c3_58, %c0_59, %c0_60] : memref<8x2x32xf32, #tpu.memory_space<vmem>>, vector<1x2x32xf32>
    %146 = vector.shape_cast %145 : vector<1x2x32xf32> to vector<2x32xf32>
    %cst_61 = arith.constant 0.000000e+00 : f32
    %147 = vector.broadcast %cst_61 : f32 to vector<2x32xf32>
    %148 = arith.cmpf ogt, %146, %147 : vector<2x32xf32>
    %149 = arith.select %148, %144, %123 : vector<2x32xi1>, vector<2x32xf32>
    %150 = arith.select %148, %142, %124 : vector<2x32xi1>, vector<2x32xf32>
    %c4_62 = arith.constant 4 : index
    %c0_63 = arith.constant 0 : index
    %c0_64 = arith.constant 0 : index
    %151 = vector.load %arg9[%c4_62, %c0_63, %c0_64] : memref<8x2x128xf32, #tpu.memory_space<vmem>>, vector<1x2x128xf32>
    %152 = vector.shape_cast %151 : vector<1x2x128xf32> to vector<2x128xf32>
    %cst_65 = arith.constant dense<0.000000e+00> : vector<2x128xf32>
    %153 = tpu.matmul %149, %38, %cst_65 {dimension_numbers = #tpu.dot_dimension_numbers<[1], [0], [0], [1], [0, 0, 1, 1], [], []>} : vector<2x32xf32>, vector<32x128xf32>, vector<2x128xf32> -> vector<2x128xf32>
    %154 = arith.addf %152, %153 : vector<2x128xf32>
    %155 = math.tanh %154 : vector<2x128xf32>
    %156 = arith.negf %154 : vector<2x128xf32>
    %157 = math.exp %156 : vector<2x128xf32>
    %cst_66 = arith.constant 1.000000e+00 : f32
    %158 = vector.broadcast %cst_66 : f32 to vector<2x128xf32>
    %159 = arith.addf %158, %157 : vector<2x128xf32>
    %160 = arith.divf %158, %159 : vector<2x128xf32>
    %161 = arith.select %44, %155, %160 : vector<2x128xi1>, vector<2x128xf32>
    %162 = vector.extract_strided_slice %161 {offsets = [0, 0], sizes = [2, 32], strides = [1, 1]} : vector<2x128xf32> to vector<2x32xf32>
    %163 = vector.extract_strided_slice %161 {offsets = [0, 32], sizes = [2, 32], strides = [1, 1]} : vector<2x128xf32> to vector<2x32xf32>
    %164 = vector.extract_strided_slice %161 {offsets = [0, 64], sizes = [2, 32], strides = [1, 1]} : vector<2x128xf32> to vector<2x32xf32>
    %165 = vector.extract_strided_slice %161 {offsets = [0, 96], sizes = [2, 32], strides = [1, 1]} : vector<2x128xf32> to vector<2x32xf32>
    %166 = arith.mulf %163, %150 : vector<2x32xf32>
    %167 = arith.mulf %162, %164 : vector<2x32xf32>
    %168 = arith.addf %166, %167 : vector<2x32xf32>
    %169 = math.tanh %168 : vector<2x32xf32>
    %170 = arith.mulf %165, %169 : vector<2x32xf32>
    %c4_67 = arith.constant 4 : index
    %c0_68 = arith.constant 0 : index
    %c0_69 = arith.constant 0 : index
    %171 = vector.load %arg1[%c4_67, %c0_68, %c0_69] : memref<8x2x32xf32, #tpu.memory_space<vmem>>, vector<1x2x32xf32>
    %172 = vector.shape_cast %171 : vector<1x2x32xf32> to vector<2x32xf32>
    %cst_70 = arith.constant 0.000000e+00 : f32
    %173 = vector.broadcast %cst_70 : f32 to vector<2x32xf32>
    %174 = arith.cmpf ogt, %172, %173 : vector<2x32xf32>
    %175 = arith.select %174, %170, %149 : vector<2x32xi1>, vector<2x32xf32>
    %176 = arith.select %174, %168, %150 : vector<2x32xi1>, vector<2x32xf32>
    %c5_71 = arith.constant 5 : index
    %c0_72 = arith.constant 0 : index
    %c0_73 = arith.constant 0 : index
    %177 = vector.load %arg9[%c5_71, %c0_72, %c0_73] : memref<8x2x128xf32, #tpu.memory_space<vmem>>, vector<1x2x128xf32>
    %178 = vector.shape_cast %177 : vector<1x2x128xf32> to vector<2x128xf32>
    %cst_74 = arith.constant dense<0.000000e+00> : vector<2x128xf32>
    %179 = tpu.matmul %175, %38, %cst_74 {dimension_numbers = #tpu.dot_dimension_numbers<[1], [0], [0], [1], [0, 0, 1, 1], [], []>} : vector<2x32xf32>, vector<32x128xf32>, vector<2x128xf32> -> vector<2x128xf32>
    %180 = arith.addf %178, %179 : vector<2x128xf32>
    %181 = math.tanh %180 : vector<2x128xf32>
    %182 = arith.negf %180 : vector<2x128xf32>
    %183 = math.exp %182 : vector<2x128xf32>
    %cst_75 = arith.constant 1.000000e+00 : f32
    %184 = vector.broadcast %cst_75 : f32 to vector<2x128xf32>
    %185 = arith.addf %184, %183 : vector<2x128xf32>
    %186 = arith.divf %184, %185 : vector<2x128xf32>
    %187 = arith.select %44, %181, %186 : vector<2x128xi1>, vector<2x128xf32>
    %188 = vector.extract_strided_slice %187 {offsets = [0, 0], sizes = [2, 32], strides = [1, 1]} : vector<2x128xf32> to vector<2x32xf32>
    %189 = vector.extract_strided_slice %187 {offsets = [0, 32], sizes = [2, 32], strides = [1, 1]} : vector<2x128xf32> to vector<2x32xf32>
    %190 = vector.extract_strided_slice %187 {offsets = [0, 64], sizes = [2, 32], strides = [1, 1]} : vector<2x128xf32> to vector<2x32xf32>
    %191 = vector.extract_strided_slice %187 {offsets = [0, 96], sizes = [2, 32], strides = [1, 1]} : vector<2x128xf32> to vector<2x32xf32>
    %192 = arith.mulf %189, %176 : vector<2x32xf32>
    %193 = arith.mulf %188, %190 : vector<2x32xf32>
    %194 = arith.addf %192, %193 : vector<2x32xf32>
    %195 = math.tanh %194 : vector<2x32xf32>
    %196 = arith.mulf %191, %195 : vector<2x32xf32>
    %c5_76 = arith.constant 5 : index
    %c0_77 = arith.constant 0 : index
    %c0_78 = arith.constant 0 : index
    %197 = vector.load %arg1[%c5_76, %c0_77, %c0_78] : memref<8x2x32xf32, #tpu.memory_space<vmem>>, vector<1x2x32xf32>
    %198 = vector.shape_cast %197 : vector<1x2x32xf32> to vector<2x32xf32>
    %cst_79 = arith.constant 0.000000e+00 : f32
    %199 = vector.broadcast %cst_79 : f32 to vector<2x32xf32>
    %200 = arith.cmpf ogt, %198, %199 : vector<2x32xf32>
    %201 = arith.select %200, %196, %175 : vector<2x32xi1>, vector<2x32xf32>
    %202 = arith.select %200, %194, %176 : vector<2x32xi1>, vector<2x32xf32>
    %c6_80 = arith.constant 6 : index
    %c0_81 = arith.constant 0 : index
    %c0_82 = arith.constant 0 : index
    %203 = vector.load %arg9[%c6_80, %c0_81, %c0_82] : memref<8x2x128xf32, #tpu.memory_space<vmem>>, vector<1x2x128xf32>
    %204 = vector.shape_cast %203 : vector<1x2x128xf32> to vector<2x128xf32>
    %cst_83 = arith.constant dense<0.000000e+00> : vector<2x128xf32>
    %205 = tpu.matmul %201, %38, %cst_83 {dimension_numbers = #tpu.dot_dimension_numbers<[1], [0], [0], [1], [0, 0, 1, 1], [], []>} : vector<2x32xf32>, vector<32x128xf32>, vector<2x128xf32> -> vector<2x128xf32>
    %206 = arith.addf %204, %205 : vector<2x128xf32>
    %207 = math.tanh %206 : vector<2x128xf32>
    %208 = arith.negf %206 : vector<2x128xf32>
    %209 = math.exp %208 : vector<2x128xf32>
    %cst_84 = arith.constant 1.000000e+00 : f32
    %210 = vector.broadcast %cst_84 : f32 to vector<2x128xf32>
    %211 = arith.addf %210, %209 : vector<2x128xf32>
    %212 = arith.divf %210, %211 : vector<2x128xf32>
    %213 = arith.select %44, %207, %212 : vector<2x128xi1>, vector<2x128xf32>
    %214 = vector.extract_strided_slice %213 {offsets = [0, 0], sizes = [2, 32], strides = [1, 1]} : vector<2x128xf32> to vector<2x32xf32>
    %215 = vector.extract_strided_slice %213 {offsets = [0, 32], sizes = [2, 32], strides = [1, 1]} : vector<2x128xf32> to vector<2x32xf32>
    %216 = vector.extract_strided_slice %213 {offsets = [0, 64], sizes = [2, 32], strides = [1, 1]} : vector<2x128xf32> to vector<2x32xf32>
    %217 = vector.extract_strided_slice %213 {offsets = [0, 96], sizes = [2, 32], strides = [1, 1]} : vector<2x128xf32> to vector<2x32xf32>
    %218 = arith.mulf %215, %202 : vector<2x32xf32>
    %219 = arith.mulf %214, %216 : vector<2x32xf32>
    %220 = arith.addf %218, %219 : vector<2x32xf32>
    %221 = math.tanh %220 : vector<2x32xf32>
    %222 = arith.mulf %217, %221 : vector<2x32xf32>
    %c6_85 = arith.constant 6 : index
    %c0_86 = arith.constant 0 : index
    %c0_87 = arith.constant 0 : index
    %223 = vector.load %arg1[%c6_85, %c0_86, %c0_87] : memref<8x2x32xf32, #tpu.memory_space<vmem>>, vector<1x2x32xf32>
    %224 = vector.shape_cast %223 : vector<1x2x32xf32> to vector<2x32xf32>
    %cst_88 = arith.constant 0.000000e+00 : f32
    %225 = vector.broadcast %cst_88 : f32 to vector<2x32xf32>
    %226 = arith.cmpf ogt, %224, %225 : vector<2x32xf32>
    %227 = arith.select %226, %222, %201 : vector<2x32xi1>, vector<2x32xf32>
    %228 = arith.select %226, %220, %202 : vector<2x32xi1>, vector<2x32xf32>
    %c7_89 = arith.constant 7 : index
    %c0_90 = arith.constant 0 : index
    %c0_91 = arith.constant 0 : index
    %229 = vector.load %arg9[%c7_89, %c0_90, %c0_91] : memref<8x2x128xf32, #tpu.memory_space<vmem>>, vector<1x2x128xf32>
    %230 = vector.shape_cast %229 : vector<1x2x128xf32> to vector<2x128xf32>
    %cst_92 = arith.constant dense<0.000000e+00> : vector<2x128xf32>
    %231 = tpu.matmul %227, %38, %cst_92 {dimension_numbers = #tpu.dot_dimension_numbers<[1], [0], [0], [1], [0, 0, 1, 1], [], []>} : vector<2x32xf32>, vector<32x128xf32>, vector<2x128xf32> -> vector<2x128xf32>
    %232 = arith.addf %230, %231 : vector<2x128xf32>
    %233 = math.tanh %232 : vector<2x128xf32>
    %234 = arith.negf %232 : vector<2x128xf32>
    %235 = math.exp %234 : vector<2x128xf32>
    %cst_93 = arith.constant 1.000000e+00 : f32
    %236 = vector.broadcast %cst_93 : f32 to vector<2x128xf32>
    %237 = arith.addf %236, %235 : vector<2x128xf32>
    %238 = arith.divf %236, %237 : vector<2x128xf32>
    %239 = arith.select %44, %233, %238 : vector<2x128xi1>, vector<2x128xf32>
    %240 = vector.extract_strided_slice %239 {offsets = [0, 0], sizes = [2, 32], strides = [1, 1]} : vector<2x128xf32> to vector<2x32xf32>
    %241 = vector.extract_strided_slice %239 {offsets = [0, 32], sizes = [2, 32], strides = [1, 1]} : vector<2x128xf32> to vector<2x32xf32>
    %242 = vector.extract_strided_slice %239 {offsets = [0, 64], sizes = [2, 32], strides = [1, 1]} : vector<2x128xf32> to vector<2x32xf32>
    %243 = vector.extract_strided_slice %239 {offsets = [0, 96], sizes = [2, 32], strides = [1, 1]} : vector<2x128xf32> to vector<2x32xf32>
    %244 = arith.mulf %241, %228 : vector<2x32xf32>
    %245 = arith.mulf %240, %242 : vector<2x32xf32>
    %246 = arith.addf %244, %245 : vector<2x32xf32>
    %247 = math.tanh %246 : vector<2x32xf32>
    %248 = arith.mulf %243, %247 : vector<2x32xf32>
    %c7_94 = arith.constant 7 : index
    %c0_95 = arith.constant 0 : index
    %c0_96 = arith.constant 0 : index
    %249 = vector.load %arg1[%c7_94, %c0_95, %c0_96] : memref<8x2x32xf32, #tpu.memory_space<vmem>>, vector<1x2x32xf32>
    %250 = vector.shape_cast %249 : vector<1x2x32xf32> to vector<2x32xf32>
    %cst_97 = arith.constant 0.000000e+00 : f32
    %251 = vector.broadcast %cst_97 : f32 to vector<2x32xf32>
    %252 = arith.cmpf ogt, %250, %251 : vector<2x32xf32>
    %253 = arith.select %252, %248, %227 : vector<2x32xi1>, vector<2x32xf32>
    %254 = vector.extract_strided_slice %71 {offsets = [0, 0], sizes = [2, 16], strides = [1, 1]} : vector<2x32xf32> to vector<2x16xf32>
    %255 = vector.extract_strided_slice %253 {offsets = [0, 16], sizes = [2, 16], strides = [1, 1]} : vector<2x32xf32> to vector<2x16xf32>
    %256 = tpu.concatenate %254, %255 in 1 : vector<2x16xf32>, vector<2x16xf32> -> vector<2x32xf32>
    %257 = vector.extract_strided_slice %97 {offsets = [0, 0], sizes = [2, 16], strides = [1, 1]} : vector<2x32xf32> to vector<2x16xf32>
    %258 = vector.extract_strided_slice %227 {offsets = [0, 16], sizes = [2, 16], strides = [1, 1]} : vector<2x32xf32> to vector<2x16xf32>
    %259 = tpu.concatenate %257, %258 in 1 : vector<2x16xf32>, vector<2x16xf32> -> vector<2x32xf32>
    %260 = vector.extract_strided_slice %123 {offsets = [0, 0], sizes = [2, 16], strides = [1, 1]} : vector<2x32xf32> to vector<2x16xf32>
    %261 = vector.extract_strided_slice %201 {offsets = [0, 16], sizes = [2, 16], strides = [1, 1]} : vector<2x32xf32> to vector<2x16xf32>
    %262 = tpu.concatenate %260, %261 in 1 : vector<2x16xf32>, vector<2x16xf32> -> vector<2x32xf32>
    %263 = vector.extract_strided_slice %149 {offsets = [0, 0], sizes = [2, 16], strides = [1, 1]} : vector<2x32xf32> to vector<2x16xf32>
    %264 = vector.extract_strided_slice %175 {offsets = [0, 16], sizes = [2, 16], strides = [1, 1]} : vector<2x32xf32> to vector<2x16xf32>
    %265 = tpu.concatenate %263, %264 in 1 : vector<2x16xf32>, vector<2x16xf32> -> vector<2x32xf32>
    %266 = vector.extract_strided_slice %175 {offsets = [0, 0], sizes = [2, 16], strides = [1, 1]} : vector<2x32xf32> to vector<2x16xf32>
    %267 = vector.extract_strided_slice %149 {offsets = [0, 16], sizes = [2, 16], strides = [1, 1]} : vector<2x32xf32> to vector<2x16xf32>
    %268 = tpu.concatenate %266, %267 in 1 : vector<2x16xf32>, vector<2x16xf32> -> vector<2x32xf32>
    %269 = vector.extract_strided_slice %201 {offsets = [0, 0], sizes = [2, 16], strides = [1, 1]} : vector<2x32xf32> to vector<2x16xf32>
    %270 = vector.extract_strided_slice %123 {offsets = [0, 16], sizes = [2, 16], strides = [1, 1]} : vector<2x32xf32> to vector<2x16xf32>
    %271 = tpu.concatenate %269, %270 in 1 : vector<2x16xf32>, vector<2x16xf32> -> vector<2x32xf32>
    %272 = vector.extract_strided_slice %227 {offsets = [0, 0], sizes = [2, 16], strides = [1, 1]} : vector<2x32xf32> to vector<2x16xf32>
    %273 = vector.extract_strided_slice %97 {offsets = [0, 16], sizes = [2, 16], strides = [1, 1]} : vector<2x32xf32> to vector<2x16xf32>
    %274 = tpu.concatenate %272, %273 in 1 : vector<2x16xf32>, vector<2x16xf32> -> vector<2x32xf32>
    %275 = vector.extract_strided_slice %253 {offsets = [0, 0], sizes = [2, 16], strides = [1, 1]} : vector<2x32xf32> to vector<2x16xf32>
    %276 = vector.extract_strided_slice %71 {offsets = [0, 16], sizes = [2, 16], strides = [1, 1]} : vector<2x32xf32> to vector<2x16xf32>
    %277 = tpu.concatenate %275, %276 in 1 : vector<2x16xf32>, vector<2x16xf32> -> vector<2x32xf32>
    %278 = tpu.concatenate %256, %259, %262, %265, %268, %271, %274, %277 in 0 : vector<2x32xf32>, vector<2x32xf32>, vector<2x32xf32>, vector<2x32xf32>, vector<2x32xf32>, vector<2x32xf32>, vector<2x32xf32>, vector<2x32xf32> -> vector<16x32xf32>
    %c0_98 = arith.constant 0 : index
    %c0_99 = arith.constant 0 : index
    %279 = vector.load %arg6[%c0_98, %c0_99] : memref<32x128xf32, #tpu.memory_space<vmem>>, vector<32x128xf32>
    %cst_100 = arith.constant dense<0.000000e+00> : vector<16x128xf32>
    %280 = tpu.matmul %278, %279, %cst_100 {dimension_numbers = #tpu.dot_dimension_numbers<[1], [0], [0], [1], [0, 0, 1, 1], [], []>} : vector<16x32xf32>, vector<32x128xf32>, vector<16x128xf32> -> vector<16x128xf32>
    %c0_101 = arith.constant 0 : index
    %c0_102 = arith.constant 0 : index
    %281 = vector.load %arg7[%c0_101, %c0_102] : memref<1x128xf32, #tpu.memory_space<vmem>>, vector<1x128xf32>
    %282 = vector.broadcast %281 : vector<1x128xf32> to vector<16x128xf32>
    %283 = arith.addf %280, %282 : vector<16x128xf32>
    %c0_103 = arith.constant 0 : index
    %c0_104 = arith.constant 0 : index
    %284 = vector.load %arg2[%c0_103, %c0_104] : memref<16x1xf32, #tpu.memory_space<vmem>>, vector<16x1xf32>
    %285 = vector.broadcast %284 : vector<16x1xf32> to vector<16x128xf32>
    %286 = arith.mulf %283, %285 : vector<16x128xf32>
    %c0_105 = arith.constant 0 : index
    %c0_106 = arith.constant 0 : index
    %287 = vector.load %arg8[%c0_105, %c0_106] : memref<16x128xf32, #tpu.memory_space<vmem>>, vector<16x128xf32>
    tpu.vector_store %arg8[%c0_105, %c0_106], %286 {strides = array<i32>} : memref<16x128xf32, #tpu.memory_space<vmem>>, vector<16x128xf32>,
    return
  }
}

</mosaic_0001>

<bundles_post_ra>
// kernel: tpu_custom_call.1
= control target key start
LH: loop header
LB: loop body
LE: loop exit
PB: predicated region body
PF: predicated region fallthrough
CT: control target
= control target key end

     0   :  { %13 = vsyncpa [#allocation4], 0  ;;  %s2091_s0 = inlined_call_operand.hbm [shape: f32[16,34], index: 0, kind: input, shape index: {}]   ;;  %s2092_s1 = inlined_call_operand.hbm [shape: f32[8,2,32], index: 1, kind: input, shape index: {}]   ;;  %s2093_s2 = inlined_call_operand.vmem [shape: f32[16,1], index: 2, kind: input, shape index: {}]   ;;  %s2094_s3 = inlined_call_operand.hbm [shape: f32[34,128], index: 3, kind: input, shape index: {}]   ;;  %s2095_s4 = inlined_call_operand.vmem [shape: f32[1,128], index: 4, kind: input, shape index: {}]   ;;  %s2096_s5 = inlined_call_operand.vmem [shape: f32[32,128], index: 5, kind: input, shape index: {}]   ;;  %s2097_s6 = inlined_call_operand.hbm [shape: f32[32,128], index: 6, kind: input, shape index: {}]   ;;  %s2098_s7 = inlined_call_operand.vmem [shape: f32[1,128], index: 7, kind: input, shape index: {}]   ;;  %s2099_s8 = inlined_call_operand.hbm [shape: f32[16,128], index: 8, kind: output, shape index: {}]  }
   0x1   :  { %14 = vsyncpa [#allocation7], 0 }
   0x2   :  { %15 = vsyncpa [#allocation10], 0 }
   0x3   :  { %16 = vsyncpa [#allocation5], 0  ;;  %s1748_s27 = smov [#allocation6]   ;;  %s1630_s9 = scalar_lea.hbm %s2092_s1, 256 }
   0x4   :  { %s34_s28 = sshll.u32 %s1748_s27, 4  ;;  %p1631_p0 = scmp.ne.s32.totalorder %s2092_s1, %s1630_s9  ;;  %s35_s28 = int_to_ptr.vmem [resolvable:$true] %s34_s28 }
   0x5   :  { %p1634_p1 = scmp.lt.u32.totalorder %s1630_s9, %s2092_s1 }
   0x7   :  { %p1636_p2 = pnand %p1634_p1, %p1631_p0 }
   0x9   :  { %1639 = shalt.err (!%p1636_p2)
}
   0xa   :  { %s1640_s14 = scalar_lea.vmem %s35_s28, 256  ;;  %p1645_p4 = scmp.lt.s32.totalorder %s35_s28, %s35_s28 }
   0xb   :  { %p1641_p3 = scmp.ne.s32.totalorder %s35_s28, %s1640_s14  ;;  %p1646_p5 = scmp.lt.s32.totalorder %s1640_s14, %s1640_s14 }
   0xd   :  { %p1647_p6 = por %p1646_p5, %p1645_p4 }
   0xf   :  { %p1648_p7 = pnand %p1647_p6, %p1641_p3 }
  0x11   :  { %1651 = shalt.err (!%p1648_p7)
}
  0x12   :  { %s1749_s15 = smov 32   ;;  %s1750_s16 = smov 2  }
  0x13   :  { %40 = dma.hbm_to_vmem [thread:$0]  %s2092_s1, 256, %s35_s28, [#allocation7], %s1749_s15, %s1749_s15, %s1750_s16  }
  0x14   :  { %s1751_s19 = smov [#allocation3]   ;;  %s1652_s23 = scalar_lea.hbm %s2091_s0, 256 }
  0x15   :  { %s22_s20 = sshll.u32 %s1751_s19, 4  ;;  %p1653_p8 = scmp.ne.s32.totalorder %s2091_s0, %s1652_s23  ;;  %s23_s20 = int_to_ptr.vmem [resolvable:$true] %s22_s20 }
  0x16   :  { %p1656_p9 = scmp.lt.u32.totalorder %s1652_s23, %s2091_s0 }
  0x18   :  { %p1658_p10 = pnand %p1656_p9, %p1653_p8 }
  0x1a   :  { %1661 = shalt.err (!%p1658_p10)
}
  0x1b   :  { %s1662_s29 = scalar_lea.vmem %s23_s20, 256  ;;  %p1667_p12 = scmp.lt.s32.totalorder %s23_s20, %s23_s20 }
  0x1c   :  { %p1663_p11 = scmp.ne.s32.totalorder %s23_s20, %s1662_s29  ;;  %p1668_p13 = scmp.lt.s32.totalorder %s1662_s29, %s1662_s29 }
  0x1e   :  { %p1669_p0 = por %p1668_p13, %p1667_p12 }
  0x20   :  { %p1670_p1 = pnand %p1669_p0, %p1663_p11 }
  0x22   :  { %1673 = shalt.err (!%p1670_p1)
}
  0x23   :  { %s1752_s1 = smov 128   ;;  %s1753_s28 = smov 8  }
  0x24   :  { %28 = dma.hbm_to_vmem [thread:$0]  %s2091_s0, 256, %s23_s20, [#allocation4], %s1752_s1, %s1752_s1, %s1753_s28  }
  0x25   :  { %s1754_s10 = smov [#allocation8]   ;;  %s1755_s12 = smov [#allocation9]  }
  0x26   :  { %s48_s11 = sshll.u32 %s1754_s10, 4  ;;  %s64_s13 = sshll.u32 %s1755_s12, 4  ;;  %s49_s11 = int_to_ptr.vmem [resolvable:$true] %s48_s11  ;;  %s1837_s13 = int_to_ptr.vmem [resolvable:$true] %s64_s13 }
  0x27   :  { %s1674_s17 = scalar_lea.hbm %s2094_s3, 640 }
  0x28   :  { %p1675_p2 = scmp.ne.s32.totalorder %s2094_s3, %s1674_s17  ;;  %p1678_p3 = scmp.lt.u32.totalorder %s1674_s17, %s2094_s3 }
  0x2a   :  { %p1680_p4 = pnand %p1678_p3, %p1675_p2 }
  0x2c   :  { %1683 = shalt.err (!%p1680_p4)
}
  0x2d   :  { %s1684_s0 = scalar_lea.vmem %s49_s11, 640  ;;  %p1689_p6 = scmp.lt.s32.totalorder %s49_s11, %s49_s11 }
  0x2e   :  { %p1685_p5 = scmp.ne.s32.totalorder %s49_s11, %s1684_s0  ;;  %p1690_p7 = scmp.lt.s32.totalorder %s1684_s0, %s1684_s0 }
  0x30   :  { %p1691_p8 = por %p1690_p7, %p1689_p6 }
  0x32   :  { %p1692_p9 = pnand %p1691_p8, %p1685_p5 }
  0x34   :  { %1695 = shalt.err (!%p1692_p9)
}
  0x35   :  { %54 = dma.hbm_to_vmem [thread:$0]  %s2094_s3, 640, %s49_s11, [#allocation7], %s1752_s1, %s1752_s1, %s1753_s28  }
  0x36   :  { %s1696_s26 = scalar_lea.hbm %s2097_s6, 512 }
  0x37   :  { %p1697_p10 = scmp.ne.s32.totalorder %s2097_s6, %s1696_s26  ;;  %p1700_p11 = scmp.lt.u32.totalorder %s1696_s26, %s2097_s6 }
  0x39   :  { %p1702_p12 = pnand %p1700_p11, %p1697_p10 }
  0x3b   :  { %1705 = shalt.err (!%p1702_p12)
}
  0x3c   :  { %s1706_s10 = scalar_lea.vmem %s1837_s13, 512  ;;  %p1711_p0 = scmp.lt.s32.totalorder %s1837_s13, %s1837_s13 }
  0x3d   :  { %p1707_p13 = scmp.ne.s32.totalorder %s1837_s13, %s1706_s10  ;;  %p1712_p1 = scmp.lt.s32.totalorder %s1706_s10, %s1706_s10 }
  0x3f   :  { %p1713_p2 = por %p1712_p1, %p1711_p0 }
  0x41   :  { %p1714_p3 = pnand %p1713_p2, %p1707_p13 }
  0x43   :  { %1717 = shalt.err (!%p1714_p3)
}
  0x44   :  { %70 = dma.hbm_to_vmem [thread:$0]  %s2097_s6, 512, %s1837_s13, [#allocation10], %s1752_s1, %s1752_s1, %s1753_s28  }
  0x45   :  { %1740 = dma.done.wait [#allocation4], 256  }
  0x46   :  { %1741 = vsyncadd [#allocation4], 4294967040 }
  0x47   :  { %1742 = dma.done.wait [#allocation7], 896  }
  0x48   :  { %1743 = vsyncadd [#allocation7], 4294966400 }
  0x49   :  { %1744 = dma.done.wait [#allocation10], 512  }
  0x4a   :  { %1745 = vsyncadd [#allocation10], 4294966784  ;;  %v1756_v0 = vmov 0.0|0.0   ;;  %vm1757_vm0 = vmmov 0   ;;  %v1758_v1 = vmov 0.0   ;;  %vm99_vm1 = vcmask 277504  }
  0x4b   :  { %1493 = vmatprep.subr.bf16.mxu1 %v1756_v0  ;;  %1394 = vmatprep.mubr.msk.f32.mxu1 %vm1757_vm0, %v1758_v1  ;;  %v87_v2 = vld [vmem:[#allocation8] sm:$0xff]  ;;  %v88_v3 = vld [vmem:[#allocation8 + $0x8] sm:$0xff]  ;;  %v89_v4 = vld [vmem:[#allocation8 + $0x10] sm:$0xff]  ;;  %vm106_vm2 = vcmask 1041408   ;;  %v204_v28 = vlaneseq  ;;  %s1760_s22 = smov 96   ;;  %vm210_vm7 = vcmask 261120  }
  0x4c   :  { %v1485_v5 = vpack.c.bf16 %v88_v3, %v87_v2  ;;  %v90_v6 = vld [vmem:[#allocation8 + $0x18] sm:$0xff]  ;;  %v85_v7 = vld [vmem:[#allocation3] sm:$0xff]  ;;  %v200_v9 = vld [vmem:[%s2096_s5] sm:$0xff]  ;;  %vm1136_vm14 = vcmask 130048   ;;  %s1762_s25 = smov [#allocation11]  }
  0x4d   :  { %v1489_v8 = vpack.c.bf16 %v90_v6, %v89_v4  ;;  %1383 = vmatprep.mubr.msk.f32.mxu0 %vm99_vm1, %v85_v7  ;;  %v201_v10 = vld [vmem:[%s2096_s5 + $0x8] sm:$0xff]  ;;  %v202_v12 = vld [vmem:[%s2096_s5 + $0x10] sm:$0xff]  ;;  %v203_v13 = vld [vmem:[%s2096_s5 + $0x18] sm:$0xff]  ;;  %v205_v30 = vand.u32 127, %v204_v28  ;;  %s1284_s26 = sshll.u32 %s1762_s25, 4  ;;  %s1285_s26 = int_to_ptr.vmem [resolvable:$true] %s1284_s26 }
  0x4e   :  { %1486 = vmatprep.subr.bf16.mxu0 %v1485_v5  ;;  %v1884_v11 = vpack.c.bf16 %v201_v10, %v200_v9  ;;  %v1893_v14 = vpack.c.bf16 %v203_v13, %v202_v12  ;;  %v91_v15 = vld [vmem:[#allocation8 + $0x20] sm:$0x3]  ;;  %v86_v16 = vld [vmem:[#allocation3 + $0x8] sm:$0xff]  ;;  %v1298_v17 = vld [vmem:[%s2095_s4] ss:$0 sm:$0xff]  ;;  %s1759_s4 = smov 64   ;;  %p1723_p5 = scmp.lt.s32.totalorder %s1285_s26, %s1285_s26 }
  0x4f   :  { %1488 = vmatpush3.bf16.msra.mxu0 %v1485_v5  ;;  %vm206_vm3 = vcmp.ge.s32.totalorder %v205_v30, 64  ;;  %vm207_vm4 = vcmp.lt.s32.totalorder %v205_v30, 96  ;;  %v310_v41 = vld [vmem:[#allocation6] sm:$0x3]  ;;  %v427_v3 = vld [vmem:[#allocation6 + $0x2] sm:$0x3] }
  0x50   :  { %1490 = vmatprep.subr.bf16.mxu0 %v1489_v8  ;;  %1495 = vmatpush3.bf16.msra.mxu1 %v1884_v11  ;;  %vm1918_vm5 = vmand %vm206_vm3, %vm207_vm4  ;;  %vm311_vm6 = vcmp.gt.f32.partialorder %v310_v41, 0.0  ;;  %vm428_vm8 = vcmp.gt.f32.partialorder %v427_v3, 0.0  ;;  %v1173_v31 = vld [vmem:[#allocation9 + $0x10] sm:$0xff]  ;;  %s1718_s27 = scalar_lea.vmem %s1285_s26, 256 }
  0x51   :  { %1496 = vmatprep.subr.bf16.mxu1 %v1756_v0  ;;  %p1719_p4 = scmp.ne.s32.totalorder %s1285_s26, %s1718_s27  ;;  %p1724_p6 = scmp.lt.s32.totalorder %s1718_s27, %s1718_s27 }
  0x53   :  { %1492 = vmatpush3.bf16.msra.mxu0 %v1489_v8  ;;  %p1725_p7 = por %p1724_p6, %p1723_p5 }
  0x54   :  { %1381 = vmatprep.subr.msk.mxu0 %vm106_vm2, %v91_v15  ;;  %1498 = vmatpush3.bf16.msra.mxu1 %v1893_v14 }
  0x55   :  { %1499 = vmatprep.subr.bf16.mxu1 %v1756_v0  ;;  %p1726_p8 = pnand %p1725_p7, %p1719_p4 }
  0x57   :  { %1382 = vmatpush3.msk.msra.mxu0 %vm106_vm2, %v91_v15  ;;  %1395 = vmatmul.mubr.f32.vlgmr.msra.gmra.mrb[0].mxu1 %v1758_v1 }
  0x58   :  { %1384 = vmatmul.mubr.msk.f32.vlgmr.msra.gmra.mrb[0].mxu0 %vm99_vm1, %v86_v16  ;;  %1501 = vmatpush3.bf16.msra.mxu1 %v1884_v11  ;;  %vm1166_vm1 = vcmask 1045504  }
  0x59   :  { %1502 = vmatprep.subr.bf16.mxu1 %v1756_v0  ;;  %1405 = vmatprep.mubr.msk.f32.mxu1 %vm1757_vm0, %v1758_v1 }
  0x5a   :  { %1505 = vmatprep.subr.bf16.mxu0 %v1756_v0  ;;  %1416 = vmatprep.mubr.msk.f32.mxu0 %vm1757_vm0, %v1758_v1 }
  0x5b   :  { %1507 = vmatpush3.bf16.msra.mxu0 %v1884_v11 }
  0x5c   :  { %1504 = vmatpush3.bf16.msra.mxu1 %v1893_v14  ;;  %1508 = vmatprep.subr.bf16.mxu0 %v1756_v0 }
  0x5d   :  { %1511 = vmatprep.subr.bf16.mxu1 %v1756_v0 }
  0x5f   :  { %1510 = vmatpush3.bf16.msra.mxu0 %v1893_v14 }
  0x60   :  { %1517 = vmatprep.subr.bf16.mxu0 %v1756_v0 }
 0x12a   :  { %v280_v18 = vpop.f32.mrb[0].mxu1 }
 0x12b   :  { %v1385_v19 = vpop.f32.mrb[0].mxu0  ;;  %v1396_v20 = vpop.f32.mrb[1].mxu1 }
 0x12c   :  { %v182_v21 = vadd.f32 %v1385_v19, %v1298_v17  ;;  %v176_v22 = vpop.f32.mrb[1].mxu0 }
 0x12d   :  { %v177_v23 = vadd.f32 %v1298_v17, %v176_v22 }
 0x12e   :  { %193 = vst [vmem:[#allocation2 + $0x8] ss:$4 sps:$4 sm:$0xff] %v182_v21  }
 0x12f   :  { %185 = vst [vmem:[#allocation2] ss:$4 sps:$4 sm:$0xff] %v177_v23  }
 0x136   :  { %v209_v24 = vld [vmem:[#allocation2] sm:$0x3]  ;;  %v322_v48 = vld [vmem:[#allocation2 + $0x2] sm:$0x3]  ;;  %v439_v10 = vld [vmem:[#allocation2 + $0x4] sm:$0x3] }
 0x137   :  { %v284_v25 = vadd.f32 %v280_v18, %v209_v24 }
 0x139   :  { %v1302_v26 = vmul.f32 -1.442695, %v284_v25 }
 0x13b   :  { %1566 = vpow2.f32 %v1302_v26 }
 0x13c   :  { %1568 = vtanh.f32 %v284_v25 }
 0x145   :  { %v1567_v27 = vpop.eup %1566 }
 0x146   :  { %v289_v29 = vadd.f32 1.0, %v1567_v27  ;;  %v1569_v32 = vpop.eup %1568 }
 0x148   :  { %1570 = vrcp.f32 %v289_v29  ;;  %v544_v29 = vld [vmem:[#allocation6 + $0x4] sm:$0x3] }
 0x149   :  { %vm545_vm9 = vcmp.gt.f32.partialorder %v544_v29, 0.0 }
 0x152   :  { %v1571_v33 = vpop.eup %1570 }
 0x153   :  { %v292_v34 = vsel %vm1918_vm5, %v1569_v32, %v1571_v33 }
 0x154   :  { %295 = vrot.lane.b32.xlu0 %v292_v34, %s1759_s4  ;;  %v293_v37 = vmul.f32 0.0, %v292_v34 }
 0x1c6   :  { %v296_v35 = vpop.permute.xlu0 %295 }
 0x1c7   :  { %v298_v36 = vmul.f32 %v296_v35, %v292_v34 }
 0x1c9   :  { %300 = vrot.lane.b32.xlu0 %v298_v36, %s1749_s15 }
 0x23b   :  { %v301_v38 = vpop.permute.xlu0 %300 }
 0x23c   :  { %v303_v39 = vadd.f32 %v301_v38, %v293_v37  ;;  %v556_v37 = vld [vmem:[#allocation2 + $0x6] sm:$0x3] }
 0x23e   :  { %1572 = vtanh.f32 %v303_v39  ;;  %318 = vrot.lane.b32.xlu0 %v303_v39, %s1760_s22 }
 0x248   :  { %v1573_v40 = vpop.eup %1572 }
 0x249   :  { %306 = vrot.lane.b32.xlu1 %v1573_v40, %s1759_s4 }
 0x2b0   :  { %v319_v42 = vpop.permute.xlu0 %318 }
 0x2b1   :  { %v321_v43 = vsel %vm311_vm6, %v319_v42, 0.0 }
 0x2b2   :  { %406 = vrot.lane.b32.xlu0 %v321_v43, %s1749_s15 }
 0x2bb   :  { %v307_v44 = vpop.permute.xlu1 %306 }
 0x2bc   :  { %v309_v45 = vmul.f32 %v307_v44, %v292_v34 }
 0x2be   :  { %313 = vrot.lane.b32.xlu1 %v309_v45, %s1749_s15 }
 0x324   :  { %v407_v60 = vpop.permute.xlu0 %406 }
 0x330   :  { %v314_v46 = vpop.permute.xlu1 %313 }
 0x331   :  { %v1930_v47 = vsel %vm311_vm6, %v314_v46, 0.0 }
 0x332   :  { %1406 = vmatmul.mubr.msk.f32.vlgmr.msra.gmra.mrb[2].mxu1 %vm210_vm7, %v1930_v47 }
 0x333   :  { %1513 = vmatpush3.bf16.msra.mxu1 %v1884_v11  ;;  %1427 = vmatprep.mubr.msk.f32.mxu1 %vm1757_vm0, %v1758_v1 }
 0x334   :  { %1514 = vmatprep.subr.bf16.mxu1 %v1756_v0 }
 0x337   :  { %1516 = vmatpush3.bf16.msra.mxu1 %v1893_v14 }
 0x338   :  { %1523 = vmatprep.subr.bf16.mxu1 %v1756_v0 }
 0x405   :  { %v392_v49 = vpop.f32.mrb[2].mxu1 }
 0x406   :  { %v396_v50 = vadd.f32 %v392_v49, %v322_v48  ;;  %v1407_v51 = vpop.f32.mrb[3].mxu1 }
 0x408   :  { %v1304_v52 = vmul.f32 -1.442695, %v396_v50 }
 0x40a   :  { %1574 = vpow2.f32 %v1304_v52 }
 0x40b   :  { %1576 = vtanh.f32 %v396_v50 }
 0x414   :  { %v1575_v53 = vpop.eup %1574 }
 0x415   :  { %v401_v54 = vadd.f32 1.0, %v1575_v53  ;;  %v1577_v55 = vpop.eup %1576 }
 0x417   :  { %1578 = vrcp.f32 %v401_v54 }
 0x421   :  { %v1579_v56 = vpop.eup %1578 }
 0x422   :  { %v404_v57 = vsel %vm1918_vm5, %v1577_v55, %v1579_v56  ;;  %v661_v55 = vld [vmem:[#allocation6 + $0x6] sm:$0x3] }
 0x423   :  { %411 = vrot.lane.b32.xlu1 %v404_v57, %s1759_s4  ;;  %v409_v61 = vmul.f32 %v407_v60, %v404_v57  ;;  %vm662_vm10 = vcmp.gt.f32.partialorder %v661_v55, 0.0 }
 0x495   :  { %v412_v58 = vpop.permute.xlu1 %411 }
 0x496   :  { %v414_v59 = vmul.f32 %v412_v58, %v404_v57 }
 0x498   :  { %416 = vrot.lane.b32.xlu1 %v414_v59, %s1749_s15 }
 0x50a   :  { %v417_v62 = vpop.permute.xlu1 %416 }
 0x50b   :  { %v419_v63 = vadd.f32 %v417_v62, %v409_v61  ;;  %v673_v62 = vld [vmem:[#allocation2 + $0x8] sm:$0x3] }
 0x50d   :  { %1580 = vtanh.f32 %v419_v63 }
 0x517   :  { %v1581_v2 = vpop.eup %1580 }
 0x518   :  { %422 = vrot.lane.b32.xlu0 %v1581_v2, %s1759_s4 }
 0x51c   :  { %435 = vrot.lane.b32.xlu0 %v419_v63, %s1760_s22 }
 0x58a   :  { %v423_v4 = vpop.permute.xlu0 %422 }
 0x58b   :  { %v425_v5 = vmul.f32 %v423_v4, %v404_v57 }
 0x58d   :  { %430 = vrot.lane.b32.xlu1 %v425_v5, %s1749_s15 }
 0x58e   :  { %v436_v6 = vpop.permute.xlu0 %435 }
 0x58f   :  { %v438_v7 = vsel %vm428_vm8, %v436_v6, %v321_v43 }
 0x590   :  { %523 = vrot.lane.b32.xlu0 %v438_v7, %s1749_s15 }
 0x5ff   :  { %v431_v8 = vpop.permute.xlu1 %430 }
 0x600   :  { %v1949_v9 = vsel %vm428_vm8, %v431_v8, %v1930_v47 }
 0x601   :  { %1417 = vmatmul.mubr.msk.f32.vlgmr.msra.gmra.mrb[2].mxu0 %vm210_vm7, %v1949_v9 }
 0x602   :  { %1519 = vmatpush3.bf16.msra.mxu0 %v1884_v11  ;;  %1438 = vmatprep.mubr.msk.f32.mxu0 %vm1757_vm0, %v1758_v1  ;;  %v524_v24 = vpop.permute.xlu0 %523 }
 0x603   :  { %1520 = vmatprep.subr.bf16.mxu0 %v1756_v0 }
 0x606   :  { %1522 = vmatpush3.bf16.msra.mxu0 %v1893_v14 }
 0x607   :  { %1529 = vmatprep.subr.bf16.mxu0 %v1756_v0 }
 0x6d4   :  { %v509_v12 = vpop.f32.mrb[2].mxu0 }
 0x6d5   :  { %v513_v13 = vadd.f32 %v509_v12, %v439_v10  ;;  %v1418_v15 = vpop.f32.mrb[3].mxu0 }
 0x6d7   :  { %v1306_v16 = vmul.f32 -1.442695, %v513_v13 }
 0x6d9   :  { %1582 = vpow2.f32 %v1306_v16 }
 0x6da   :  { %1584 = vtanh.f32 %v513_v13 }
 0x6e3   :  { %v1583_v17 = vpop.eup %1582 }
 0x6e4   :  { %v518_v18 = vadd.f32 1.0, %v1583_v17  ;;  %v1585_v19 = vpop.eup %1584 }
 0x6e6   :  { %1586 = vrcp.f32 %v518_v18 }
 0x6f0   :  { %v1587_v20 = vpop.eup %1586 }
 0x6f1   :  { %v521_v21 = vsel %vm1918_vm5, %v1585_v19, %v1587_v20  ;;  %v778_v20 = vld [vmem:[#allocation6 + $0x8] sm:$0x3] }
 0x6f2   :  { %528 = vrot.lane.b32.xlu1 %v521_v21, %s1759_s4  ;;  %v526_v25 = vmul.f32 %v524_v24, %v521_v21  ;;  %vm779_vm11 = vcmp.gt.f32.partialorder %v778_v20, 0.0 }
 0x764   :  { %v529_v22 = vpop.permute.xlu1 %528 }
 0x765   :  { %v531_v23 = vmul.f32 %v529_v22, %v521_v21 }
 0x767   :  { %533 = vrot.lane.b32.xlu1 %v531_v23, %s1749_s15 }
 0x7d9   :  { %v534_v26 = vpop.permute.xlu1 %533 }
 0x7da   :  { %v536_v27 = vadd.f32 %v534_v26, %v526_v25 }
 0x7dc   :  { %1588 = vtanh.f32 %v536_v27 }
 0x7e6   :  { %v1589_v28 = vpop.eup %1588 }
 0x7e7   :  { %539 = vrot.lane.b32.xlu0 %v1589_v28, %s1759_s4 }
 0x7eb   :  { %552 = vrot.lane.b32.xlu0 %v536_v27, %s1760_s22  ;;  %v790_v27 = vld [vmem:[#allocation2 + $0xa] sm:$0x3] }
 0x859   :  { %v540_v30 = vpop.permute.xlu0 %539 }
 0x85a   :  { %v542_v32 = vmul.f32 %v540_v30, %v521_v21 }
 0x85c   :  { %547 = vrot.lane.b32.xlu1 %v542_v32, %s1749_s15 }
 0x85d   :  { %v553_v33 = vpop.permute.xlu0 %552 }
 0x85e   :  { %v555_v34 = vsel %vm545_vm9, %v553_v33, %v438_v7 }
 0x85f   :  { %640 = vrot.lane.b32.xlu0 %v555_v34, %s1749_s15 }
 0x8ce   :  { %v548_v35 = vpop.permute.xlu1 %547 }
 0x8cf   :  { %v1968_v36 = vsel %vm545_vm9, %v548_v35, %v1949_v9 }
 0x8d0   :  { %1428 = vmatmul.mubr.msk.f32.vlgmr.msra.gmra.mrb[4].mxu1 %vm210_vm7, %v1968_v36 }
 0x8d1   :  { %1525 = vmatpush3.bf16.msra.mxu1 %v1884_v11  ;;  %1449 = vmatprep.mubr.msk.f32.mxu1 %vm1757_vm0, %v1758_v1  ;;  %v641_v50 = vpop.permute.xlu0 %640 }
 0x8d2   :  { %1526 = vmatprep.subr.bf16.mxu1 %v1756_v0 }
 0x8d5   :  { %1528 = vmatpush3.bf16.msra.mxu1 %v1893_v14 }
 0x8d6   :  { %1535 = vmatprep.subr.bf16.mxu1 %v1756_v0 }
 0x9a3   :  { %v626_v38 = vpop.f32.mrb[4].mxu1 }
 0x9a4   :  { %v630_v39 = vadd.f32 %v626_v38, %v556_v37  ;;  %v1429_v40 = vpop.f32.mrb[5].mxu1 }
 0x9a6   :  { %v1308_v41 = vmul.f32 -1.442695, %v630_v39 }
 0x9a8   :  { %1590 = vpow2.f32 %v1308_v41 }
 0x9a9   :  { %1592 = vtanh.f32 %v630_v39 }
 0x9b2   :  { %v1591_v42 = vpop.eup %1590 }
 0x9b3   :  { %v635_v43 = vadd.f32 1.0, %v1591_v42  ;;  %v1593_v44 = vpop.eup %1592  ;;  %v895_v42 = vld [vmem:[#allocation6 + $0xa] sm:$0x3] }
 0x9b4   :  { %vm896_vm12 = vcmp.gt.f32.partialorder %v895_v42, 0.0  ;;  %v1129_v42 = vld [vmem:[#allocation6 + $0xe] sm:$0x3] }
 0x9b5   :  { %1594 = vrcp.f32 %v635_v43  ;;  %vm1130_vm15 = vcmp.gt.f32.partialorder %v1129_v42, 0.0 }
 0x9bf   :  { %v1595_v45 = vpop.eup %1594 }
 0x9c0   :  { %v638_v46 = vsel %vm1918_vm5, %v1593_v44, %v1595_v45 }
 0x9c1   :  { %645 = vrot.lane.b32.xlu1 %v638_v46, %s1759_s4  ;;  %v643_v51 = vmul.f32 %v641_v50, %v638_v46  ;;  %v907_v50 = vld [vmem:[#allocation2 + $0xc] sm:$0x3] }
 0xa33   :  { %v646_v48 = vpop.permute.xlu1 %645 }
 0xa34   :  { %v648_v49 = vmul.f32 %v646_v48, %v638_v46 }
 0xa36   :  { %650 = vrot.lane.b32.xlu1 %v648_v49, %s1749_s15 }
 0xaa8   :  { %v651_v52 = vpop.permute.xlu1 %650 }
 0xaa9   :  { %v653_v53 = vadd.f32 %v651_v52, %v643_v51 }
 0xaab   :  { %1596 = vtanh.f32 %v653_v53 }
 0xab5   :  { %v1597_v54 = vpop.eup %1596 }
 0xab6   :  { %656 = vrot.lane.b32.xlu0 %v1597_v54, %s1759_s4 }
 0xaba   :  { %669 = vrot.lane.b32.xlu0 %v653_v53, %s1760_s22 }
 0xb28   :  { %v657_v56 = vpop.permute.xlu0 %656 }
 0xb29   :  { %v659_v57 = vmul.f32 %v657_v56, %v638_v46 }
 0xb2b   :  { %664 = vrot.lane.b32.xlu1 %v659_v57, %s1749_s15 }
 0xb2c   :  { %v670_v58 = vpop.permute.xlu0 %669 }
 0xb2d   :  { %v672_v59 = vsel %vm662_vm10, %v670_v58, %v555_v34 }
 0xb2e   :  { %757 = vrot.lane.b32.xlu0 %v672_v59, %s1749_s15 }
 0xb9d   :  { %v665_v60 = vpop.permute.xlu1 %664 }
 0xb9e   :  { %v1987_v61 = vsel %vm662_vm10, %v665_v60, %v1968_v36 }
 0xb9f   :  { %1439 = vmatmul.mubr.msk.f32.vlgmr.msra.gmra.mrb[4].mxu0 %vm210_vm7, %v1987_v61 }
 0xba0   :  { %1531 = vmatpush3.bf16.msra.mxu0 %v1884_v11  ;;  %1460 = vmatprep.mubr.msk.f32.mxu0 %vm1757_vm0, %v1758_v1  ;;  %v758_v15 = vpop.permute.xlu0 %757 }
 0xba1   :  { %1532 = vmatprep.subr.bf16.mxu0 %v1756_v0 }
 0xba4   :  { %1534 = vmatpush3.bf16.msra.mxu0 %v1893_v14 }
 0xc72   :  { %v743_v63 = vpop.f32.mrb[4].mxu0 }
 0xc73   :  { %v747_v2 = vadd.f32 %v743_v63, %v673_v62  ;;  %v1440_v3 = vpop.f32.mrb[5].mxu0 }
 0xc75   :  { %v1310_v4 = vmul.f32 -1.442695, %v747_v2 }
 0xc77   :  { %1598 = vpow2.f32 %v1310_v4 }
 0xc78   :  { %1600 = vtanh.f32 %v747_v2 }
 0xc81   :  { %v1599_v5 = vpop.eup %1598 }
 0xc82   :  { %v752_v6 = vadd.f32 1.0, %v1599_v5  ;;  %v1601_v7 = vpop.eup %1600 }
 0xc84   :  { %1602 = vrcp.f32 %v752_v6  ;;  %v1012_v6 = vld [vmem:[#allocation6 + $0xc] sm:$0x3] }
 0xc85   :  { %vm1013_vm13 = vcmp.gt.f32.partialorder %v1012_v6, 0.0 }
 0xc8e   :  { %v1603_v8 = vpop.eup %1602 }
 0xc8f   :  { %v755_v10 = vsel %vm1918_vm5, %v1601_v7, %v1603_v8 }
 0xc90   :  { %762 = vrot.lane.b32.xlu1 %v755_v10, %s1759_s4  ;;  %v760_v16 = vmul.f32 %v758_v15, %v755_v10 }
 0xd02   :  { %v763_v12 = vpop.permute.xlu1 %762 }
 0xd03   :  { %v765_v13 = vmul.f32 %v763_v12, %v755_v10 }
 0xd05   :  { %767 = vrot.lane.b32.xlu1 %v765_v13, %s1749_s15 }
 0xd77   :  { %v768_v17 = vpop.permute.xlu1 %767 }
 0xd78   :  { %v770_v18 = vadd.f32 %v768_v17, %v760_v16  ;;  %v1024_v16 = vld [vmem:[#allocation2 + $0xe] sm:$0x3] }
 0xd7a   :  { %1604 = vtanh.f32 %v770_v18 }
 0xd84   :  { %v1605_v19 = vpop.eup %1604 }
 0xd85   :  { %773 = vrot.lane.b32.xlu0 %v1605_v19, %s1759_s4 }
 0xd89   :  { %786 = vrot.lane.b32.xlu0 %v770_v18, %s1760_s22 }
 0xdf7   :  { %v774_v21 = vpop.permute.xlu0 %773 }
 0xdf8   :  { %v776_v22 = vmul.f32 %v774_v21, %v755_v10 }
 0xdfa   :  { %781 = vrot.lane.b32.xlu1 %v776_v22, %s1749_s15 }
 0xdfb   :  { %v787_v23 = vpop.permute.xlu0 %786 }
 0xdfc   :  { %v789_v24 = vsel %vm779_vm11, %v787_v23, %v672_v59 }
 0xdfd   :  { %874 = vrot.lane.b32.xlu0 %v789_v24, %s1749_s15 }
 0xe6c   :  { %v782_v25 = vpop.permute.xlu1 %781 }
 0xe6d   :  { %v2005_v26 = vsel %vm779_vm11, %v782_v25, %v1987_v61 }
 0xe6e   :  { %1450 = vmatmul.mubr.msk.f32.vlgmr.msra.gmra.mrb[6].mxu1 %vm210_vm7, %v2005_v26 }
 0xe6f   :  { %1537 = vmatpush3.bf16.msra.mxu1 %v1884_v11  ;;  %1471 = vmatprep.mubr.msk.f32.mxu1 %vm1757_vm0, %v1758_v1  ;;  %vm1164_vm0 = vcmask 1043456  }
 0xe70   :  { %1538 = vmatprep.subr.bf16.mxu1 %v1756_v0 }
 0xe73   :  { %1540 = vmatpush3.bf16.msra.mxu1 %v1893_v14  ;;  %v875_v14 = vpop.permute.xlu0 %874 }
 0xf41   :  { %v860_v28 = vpop.f32.mrb[6].mxu1 }
 0xf42   :  { %v864_v29 = vadd.f32 %v860_v28, %v790_v27  ;;  %v1451_v30 = vpop.f32.mrb[7].mxu1 }
 0xf44   :  { %v1312_v32 = vmul.f32 -1.442695, %v864_v29 }
 0xf46   :  { %1606 = vpow2.f32 %v1312_v32 }
 0xf47   :  { %1608 = vtanh.f32 %v864_v29 }
 0xf50   :  { %v1607_v33 = vpop.eup %1606 }
 0xf51   :  { %v869_v34 = vadd.f32 1.0, %v1607_v33  ;;  %v1609_v35 = vpop.eup %1608 }
 0xf53   :  { %1610 = vrcp.f32 %v869_v34  ;;  %v1171_v34 = vld [vmem:[#allocation9] sm:$0xff] }
 0xf5d   :  { %v1611_v37 = vpop.eup %1610 }
 0xf5e   :  { %v872_v11 = vsel %vm1918_vm5, %v1609_v35, %v1611_v37  ;;  %v1172_v35 = vld [vmem:[#allocation9 + $0x8] sm:$0xff] }
 0xf5f   :  { %879 = vrot.lane.b32.xlu1 %v872_v11, %s1759_s4  ;;  %v877_v38 = vmul.f32 %v875_v14, %v872_v11  ;;  %v1541_v37 = vpack.c.bf16 %v1172_v35, %v1171_v34  ;;  %v1263_v14 = vld [vmem:[%s2093_s2] sm:$0xff] }
 0xf61   :  { %1542 = vmatprep.subr.bf16.mxu0 %v1541_v37 }
 0xfd1   :  { %v880_v0 = vpop.permute.xlu1 %879 }
 0xfd2   :  { %v882_v1 = vmul.f32 %v880_v0, %v872_v11  ;;  %v1174_v0 = vld [vmem:[#allocation9 + $0x18] sm:$0xff] }
 0xfd4   :  { %884 = vrot.lane.b32.xlu1 %v882_v1, %s1749_s15  ;;  %v1545_v1 = vpack.c.bf16 %v1174_v0, %v1173_v31 }
0x1046   :  { %v885_v39 = vpop.permute.xlu1 %884 }
0x1047   :  { %v887_v40 = vadd.f32 %v885_v39, %v877_v38  ;;  %v1761_v38 = vmov 0  }
0x1048   :  { %1565 = vset.pattern.permute.xlu1 %v1761_v38  ;;  %1564 = vset.pattern.permute.xlu0 %v1761_v38 }
0x1049   :  { %1612 = vtanh.f32 %v887_v40 }
0x1053   :  { %v1613_v41 = vpop.eup %1612 }
0x1054   :  { %890 = vrot.lane.b32.xlu0 %v1613_v41, %s1759_s4  ;;  %v1264_v41 = vld [vmem:[%s2093_s2 + $0x8] sm:$0xff] }
0x1058   :  { %903 = vrot.lane.b32.xlu0 %v887_v40, %s1760_s22 }
0x10c6   :  { %v891_v43 = vpop.permute.xlu0 %890 }
0x10c7   :  { %v893_v44 = vmul.f32 %v891_v43, %v872_v11 }
0x10c9   :  { %898 = vrot.lane.b32.xlu1 %v893_v44, %s1749_s15 }
0x10ca   :  { %v904_v45 = vpop.permute.xlu0 %903 }
0x10cb   :  { %v906_v46 = vsel %vm896_vm12, %v904_v45, %v789_v24 }
0x10cc   :  { %991 = vrot.lane.b32.xlu0 %v906_v46, %s1749_s15 }
0x113b   :  { %v899_v48 = vpop.permute.xlu1 %898 }
0x113c   :  { %v2023_v49 = vsel %vm896_vm12, %v899_v48, %v2005_v26 }
0x113d   :  { %1461 = vmatmul.mubr.msk.f32.vlgmr.msra.gmra.mrb[6].mxu0 %vm210_vm7, %v2023_v49  ;;  %v1142_v43 = vsel %vm1136_vm14, %v2023_v49, %v1968_v36 }
0x113e   :  { %v992_v63 = vpop.permute.xlu0 %991  ;;  %1544 = vmatpush3.bf16.msra.mxu0 %v1541_v37  ;;  %v1155_v48 = vrot.slane %v1142_v43, 6 }
0x113f   :  { %1546 = vmatprep.subr.bf16.mxu0 %v1545_v1 }
0x1142   :  { %1548 = vmatpush3.bf16.msra.mxu0 %v1545_v1 }
0x1210   :  { %v977_v51 = vpop.f32.mrb[6].mxu0 }
0x1211   :  { %v981_v52 = vadd.f32 %v977_v51, %v907_v50  ;;  %v1462_v53 = vpop.f32.mrb[7].mxu0  ;;  %v1140_v50 = vsel %vm1136_vm14, %v1987_v61, %v2005_v26 }
0x1212   :  { %v1141_v53 = vsel %vm1136_vm14, %v2005_v26, %v1987_v61 }
0x1213   :  { %v1314_v54 = vmul.f32 -1.442695, %v981_v52 }
0x1215   :  { %1614 = vpow2.f32 %v1314_v54 }
0x1216   :  { %1616 = vtanh.f32 %v981_v52 }
0x121f   :  { %v1615_v55 = vpop.eup %1614 }
0x1220   :  { %v986_v56 = vadd.f32 1.0, %v1615_v55  ;;  %v1617_v57 = vpop.eup %1616 }
0x1222   :  { %1618 = vrcp.f32 %v986_v56 }
0x122c   :  { %v1619_v58 = vpop.eup %1618 }
0x122d   :  { %v989_v59 = vsel %vm1918_vm5, %v1617_v57, %v1619_v58 }
0x122e   :  { %996 = vrot.lane.b32.xlu1 %v989_v59, %s1759_s4  ;;  %v994_v2 = vmul.f32 %v992_v63, %v989_v59  ;;  %v1317_v63 = vld [vmem:[%s2098_s7] ss:$0 sm:$0xff] }
0x12a0   :  { %v997_v60 = vpop.permute.xlu1 %996 }
0x12a1   :  { %v999_v62 = vmul.f32 %v997_v60, %v989_v59 }
0x12a3   :  { %1001 = vrot.lane.b32.xlu1 %v999_v62, %s1749_s15 }
0x1315   :  { %v1002_v3 = vpop.permute.xlu1 %1001 }
0x1316   :  { %v1004_v4 = vadd.f32 %v1002_v3, %v994_v2 }
0x1318   :  { %1620 = vtanh.f32 %v1004_v4 }
0x1322   :  { %v1621_v5 = vpop.eup %1620 }
0x1323   :  { %1007 = vrot.lane.b32.xlu0 %v1621_v5, %s1759_s4 }
0x1327   :  { %1020 = vrot.lane.b32.xlu0 %v1004_v4, %s1760_s22 }
0x1395   :  { %v1008_v7 = vpop.permute.xlu0 %1007 }
0x1396   :  { %v1010_v8 = vmul.f32 %v1008_v7, %v989_v59  ;;  %v1168_v59 = vsel %vm106_vm2, %v1141_v53, %v1155_v48 }
0x1398   :  { %1015 = vrot.lane.b32.xlu1 %v1010_v8, %s1749_s15 }
0x1399   :  { %v1021_v10 = vpop.permute.xlu0 %1020 }
0x139a   :  { %v1023_v12 = vsel %vm1013_vm13, %v1021_v10, %v906_v46  ;;  %v1139_v46 = vsel %vm1136_vm14, %v1968_v36, %v2023_v49 }
0x139b   :  { %1108 = vrot.lane.b32.xlu0 %v1023_v12, %s1749_s15 }
0x140a   :  { %v1016_v13 = vpop.permute.xlu1 %1015 }
0x140b   :  { %v1018_v15 = vsel %vm1013_vm13, %v1016_v13, %v2023_v49  ;;  %v1152_v49 = vrot.slane %v1140_v50, 2 }
0x140c   :  { %1472 = vmatmul.mubr.msk.f32.vlgmr.msra.gmra.mrb[8].mxu1 %vm210_vm7, %v1018_v15  ;;  %v1143_v44 = vsel %vm1136_vm14, %v1018_v15, %v1949_v9  ;;  %v1138_v45 = vsel %vm1136_vm14, %v1949_v9, %v1018_v15  ;;  %v1149_v9 = vrot.slane %v1139_v46, 4 }
0x140d   :  { %v1109_v29 = vpop.permute.xlu0 %1108  ;;  %v1158_v51 = vrot.slane %v1143_v44, 4  ;;  %v1146_v54 = vrot.slane %v1138_v45, 6 }
0x140f   :  { %v1169_v62 = vsel %vm1164_vm0, %v1168_v59, %v1158_v51 }
0x14df   :  { %v1094_v17 = vpop.f32.mrb[8].mxu1 }
0x14e0   :  { %v1098_v18 = vadd.f32 %v1094_v17, %v1024_v16  ;;  %v1473_v19 = vpop.f32.mrb[9].mxu1 }
0x14e2   :  { %v1316_v20 = vmul.f32 -1.442695, %v1098_v18 }
0x14e4   :  { %1622 = vpow2.f32 %v1316_v20 }
0x14e5   :  { %1624 = vtanh.f32 %v1098_v18 }
0x14ee   :  { %v1623_v21 = vpop.eup %1622 }
0x14ef   :  { %v1103_v22 = vadd.f32 1.0, %v1623_v21  ;;  %v1625_v23 = vpop.eup %1624 }
0x14f1   :  { %1626 = vrcp.f32 %v1103_v22 }
0x14fb   :  { %v1627_v24 = vpop.eup %1626 }
0x14fc   :  { %v1106_v25 = vsel %vm1918_vm5, %v1625_v23, %v1627_v24 }
0x14fd   :  { %1113 = vrot.lane.b32.xlu1 %v1106_v25, %s1759_s4  ;;  %v1111_v30 = vmul.f32 %v1109_v29, %v1106_v25 }
0x156f   :  { %v1114_v27 = vpop.permute.xlu1 %1113 }
0x1570   :  { %v1116_v28 = vmul.f32 %v1114_v27, %v1106_v25 }
0x1572   :  { %1118 = vrot.lane.b32.xlu1 %v1116_v28, %s1749_s15 }
0x15e4   :  { %v1119_v32 = vpop.permute.xlu1 %1118 }
0x15e5   :  { %v1121_v33 = vadd.f32 %v1119_v32, %v1111_v30 }
0x15e7   :  { %1628 = vtanh.f32 %v1121_v33 }
0x15f1   :  { %v1629_v11 = vpop.eup %1628 }
0x15f2   :  { %1124 = vrot.lane.b32.xlu0 %v1629_v11, %s1759_s4 }
0x15f6   :  { %1267 = vperm.xlu0 %1564, %v1263_v14  }
0x1664   :  { %v1125_v39 = vpop.permute.xlu0 %1124 }
0x1665   :  { %v1127_v40 = vmul.f32 %v1125_v39, %v1106_v25 }
0x1667   :  { %1132 = vrot.lane.b32.xlu1 %v1127_v40, %s1749_s15 }
0x166b   :  { %1272 = vperm.xlu1 %1565, %v1264_v41  }
0x1675   :  { %v1268_v5 = vpop.permute.xlu0 %1267 }
0x16d9   :  { %v1133_v52 = vpop.permute.xlu1 %1132 }
0x16da   :  { %v1135_v55 = vsel %vm1130_vm15, %v1133_v52, %v1018_v15 }
0x16db   :  { %v1137_v56 = vsel %vm1136_vm14, %v1930_v47, %v1135_v55  ;;  %v1144_v36 = vsel %vm1136_vm14, %v1135_v55, %v1930_v47 }
0x16dc   :  { %v1161_v57 = vrot.slane %v1144_v36, 2  ;;  %v1163_v58 = vsel %vm106_vm2, %v1137_v56, %v1146_v54 }
0x16dd   :  { %v1165_v60 = vsel %vm1164_vm0, %v1163_v58, %v1149_v9 }
0x16de   :  { %v1167_v61 = vsel %vm1166_vm1, %v1165_v60, %v1152_v49  ;;  %v1170_v26 = vsel %vm1166_vm1, %v1169_v62, %v1161_v57 }
0x16df   :  { %1482 = vmatprep.mubr.msk.f32.mxu0 %vm210_vm7, %v1167_v61 }
0x16e0   :  { %1483 = vmatmul.mubr.msk.f32.vlgmr.msra.gmra.mrb[8].mxu0 %vm210_vm7, %v1170_v26 }
0x16ea   :  { %v1273_v2 = vpop.permute.xlu1 %1272 }
0x17b3   :  { %v1484_v47 = vpop.f32.mrb[8].mxu0 }
0x17b4   :  { %v1260_v3 = vadd.f32 %v1484_v47, %v1317_v63  ;;  %v1254_v4 = vpop.f32.mrb[9].mxu0 }
0x17b5   :  { %v1255_v6 = vadd.f32 %v1317_v63, %v1254_v4 }
0x17b6   :  { %v1276_v7 = vmul.f32 %v1273_v2, %v1260_v3 }
0x17b7   :  { %v1275_v8 = vmul.f32 %v1268_v5, %v1255_v6 }
0x17b8   :  { %1278 = vst [vmem:[#allocation11 + $0x8] sm:$0xff] %v1276_v7 }
0x17b9   :  { %1277 = vst [vmem:[#allocation11] sm:$0xff] %v1275_v8 }
0x17ba   :  { %1729 = shalt.err (!%p1726_p8)
}
0x17bb   :  { %s1730_s30 = scalar_lea.hbm %s2099_s8, 256 }
0x17bc   :  { %p1731_p9 = scmp.ne.s32.totalorder %s2099_s8, %s1730_s30  ;;  %p1734_p10 = scmp.lt.u32.totalorder %s1730_s30, %s2099_s8 }
0x17be   :  { %p1736_p11 = pnand %p1734_p10, %p1731_p9 }
0x17c0   :  { %1739 = shalt.err (!%p1736_p11)
}
0x17c1   :  { %1290 = dma.vmem_to_hbm [thread:$0]  %s1285_s26, 256, %s2099_s8, [#allocation5], %s1752_s1, %s1752_s1, %s1753_s28  }
0x17c2   :  { %1746 = dma.done.wait [#allocation5], 256  }
0x17c3   :  { %1747 = vsyncadd [#allocation5], 4294967040 }
0x17c4   :  { %1294 = vsyncpa [#allocation4], 1 }
0x17c5   :  { %1295 = vsyncpa [#allocation7], 1 }
0x17c6   :  { %1296 = vsyncpa [#allocation10], 1 }
0x17c7   :  { %1297 = vsyncpa [#allocation5], 1 }

</bundles_post_ra>
